<compile_context>
chip_gen: v6e
topology: v6e:2x2x1
jax: 0.10.0
libtpu: 0.0.40
codegen_flags: <defaults>
</compile_context>

<pallas_src>
import jax
import jax.numpy as jnp
from jax.experimental import pallas as pl
from jax.experimental.pallas import tpu as pltpu


def _group_matrix(channels: int, groups: int) -> jnp.ndarray:
    """M[i, j] = 1 if channels i and j belong to the same GroupNorm group."""
    cpg = channels // groups
    gidx = jnp.arange(channels) // cpg
    return (gidx[:, None] == gidx[None, :]).astype(jnp.float32)


def _boundary_masks(H: int, W: int) -> jnp.ndarray:
    """(9, H*W) validity masks for the 9 conv taps (shared by both convs)."""
    yy, xx = jnp.meshgrid(jnp.arange(H), jnp.arange(W), indexing="ij")
    yy = yy.reshape(H * W)
    xx = xx.reshape(H * W)
    rows = []
    for k in range(9):
        dy = k // 3 - 1
        dx = k % 3 - 1
        valid = ((yy + dy >= 0) & (yy + dy < H) &
                 (xx + dx >= 0) & (xx + dx < W))
        rows.append(valid.astype(jnp.float32))
    return jnp.stack(rows, axis=0)


def resblock_pallas(x_nchw, time_emb, params):
    """Fused ResBlock forward. x_nchw: (N, Cin, H, W), time_emb: (N, T)."""
    N, Cin, H, W = x_nchw.shape
    Cout = params["w1"].shape[0]
    HW = H * W
    g1 = min(8, Cin)
    g2 = min(8, Cout)
    assert Cin % g1 == 0 and Cout % g2 == 0, "channels must divide group count"
    cpg1 = Cin // g1
    cpg2 = Cout // g2

    # ---- glue: layout / parameter massaging (plain JAX) -------------------
    x_flat = x_nchw.reshape(N, Cin, HW).astype(jnp.float32)          # (N, Cin, HW)

    # time MLP hoisted out of the kernel: one batched matmul in XLA
    t_proj = (time_emb.astype(jnp.float32) @ params["wt"] + params["bt"])
    t_proj = t_proj.reshape(N, Cout, 1)                               # (N, Cout, 1)

    # torch conv weights (Cout, Cin, 3, 3) -> one wide-K matrix (Cout, 9*Cin),
    # column ordering = tap-major (k*Cin + cin), matching the in-kernel concat.
    w1_cat = jnp.transpose(params["w1"], (0, 2, 3, 1)).reshape(Cout, 9 * Cin)
    w1_cat = w1_cat.astype(jnp.bfloat16)
    w2_cat = jnp.transpose(params["w2"], (0, 2, 3, 1)).reshape(Cout, 9 * Cout)
    w2_cat = w2_cat.astype(jnp.bfloat16)
    ws = params["ws"][:, :, 0, 0].astype(jnp.bfloat16)                # (Cout, Cin)

    gn1_g = params["gn1_g"].reshape(Cin, 1).astype(jnp.float32)
    gn1_b = params["gn1_b"].reshape(Cin, 1).astype(jnp.float32)
    gn2_g = params["gn2_g"].reshape(Cout, 1).astype(jnp.float32)
    gn2_b = params["gn2_b"].reshape(Cout, 1).astype(jnp.float32)
    b1 = params["b1"].reshape(Cout, 1).astype(jnp.float32)
    b2 = params["b2"].reshape(Cout, 1).astype(jnp.float32)
    bs = params["bs"].reshape(Cout, 1).astype(jnp.float32)

    M1 = _group_matrix(Cin, g1)                                       # (Cin, Cin)
    M2 = _group_matrix(Cout, g2)                                      # (Cout, Cout)
    masks = _boundary_masks(H, W)                                     # (9, HW)

    # ---- the fused kernel --------------------------------------------------
    def kernel(x_ref, t_ref, mask_ref,
               g1w_ref, g1b_ref, m1_ref, w1_ref, b1_ref,
               g2w_ref, g2b_ref, m2_ref, w2_ref, b2_ref,
               ws_ref, bs_ref, out_ref):

        x2 = x_ref[0]                  # (Cin, HW)  f32
        masks_v = mask_ref[...]        # (9, HW)    f32, shared by both convs

        def groupnorm(z, gamma, beta, m_mat, cpg):
            # per-channel {sum, sumsq}, aggregated within groups by one matmul
            n_elems = float(HW * cpg)
            s = jnp.sum(z, axis=1, keepdims=True)                    # (C, 1)
            ssq = jnp.sum(z * z, axis=1, keepdims=True)              # (C, 1)
            st = jnp.concatenate([s, ssq], axis=1)                   # (C, 2)
            g = jnp.dot(m_mat, st, preferred_element_type=jnp.float32)
            mean = g[:, 0:1] / n_elems
            var = g[:, 1:2] / n_elems - mean * mean
            inv = jax.lax.rsqrt(var + 1e-5)
            return (z - mean) * inv * gamma + beta

        def conv3x3(z, w_cat_ref, bias):
            # z: (Cin_t, HW) f32; w_cat: (Cout_t, 9*Cin_t) bf16
            # Build (9*Cin_t, HW) bf16 from the 9 shifted+masked taps, then a
            # single wide-K matmul on the MXU with f32 accumulation.
            taps = []
            for k in range(9):
                dy = k // 3 - 1
                dx = k % 3 - 1
                s = dy * W + dx
                shifted = z if s == 0 else pltpu.roll(z, (-s) % HW, axis=1)
                taps.append((shifted * masks_v[k:k + 1, :]).astype(jnp.bfloat16))
            z_cat = jnp.concatenate(taps, axis=0)                    # (9*Cin_t, HW)
            acc = jnp.dot(w_cat_ref[...], z_cat,
                          preferred_element_type=jnp.float32)        # (Cout_t, HW)
            return acc + bias

        # block1: GN -> SiLU -> conv3x3
        h = groupnorm(x2, g1w_ref[...], g1b_ref[...], m1_ref[...], cpg1)
        h = h * jax.nn.sigmoid(h)
        h = conv3x3(h, w1_ref, b1_ref[...])

        # time embedding broadcast-add (projection already done in wrapper)
        h = h + t_ref[0]                                             # (Cout, 1)

        # block2: GN -> SiLU -> conv3x3
        h = groupnorm(h, g2w_ref[...], g2b_ref[...], m2_ref[...], cpg2)
        h = h * jax.nn.sigmoid(h)
        h = conv3x3(h, w2_ref, b2_ref[...])

        # 1x1 conv shortcut (bf16 matmul, f32 accumulate / residual add)
        sc = jnp.dot(ws_ref[...], x2.astype(jnp.bfloat16),
                     preferred_element_type=jnp.float32) + bs_ref[...]
        out_ref[0] = (h + sc).astype(out_ref.dtype)

    def full_spec(shape):
        return pl.BlockSpec(shape, lambda b, n=len(shape): (0,) * n)

    out_flat = pl.pallas_call(
        kernel,
        out_shape=jax.ShapeDtypeStruct((N, Cout, HW), jnp.float32),
        grid=(N,),
        in_specs=[
            pl.BlockSpec((1, Cin, HW), lambda b: (b, 0, 0)),    # x (per batch)
            pl.BlockSpec((1, Cout, 1), lambda b: (b, 0, 0)),    # projected time emb
            full_spec((9, HW)),                                 # boundary masks
            full_spec((Cin, 1)), full_spec((Cin, 1)), full_spec((Cin, Cin)),
            full_spec((Cout, 9 * Cin)), full_spec((Cout, 1)),
            full_spec((Cout, 1)), full_spec((Cout, 1)), full_spec((Cout, Cout)),
            full_spec((Cout, 9 * Cout)), full_spec((Cout, 1)),
            full_spec((Cout, Cin)), full_spec((Cout, 1)),
        ],
        out_specs=pl.BlockSpec((1, Cout, HW), lambda b: (b, 0, 0)),
        compiler_params=pltpu.CompilerParams(
            dimension_semantics=("parallel",)),
    )(x_flat, t_proj, masks,
      gn1_g, gn1_b, M1, w1_cat, b1,
      gn2_g, gn2_b, M2, w2_cat, b2,
      ws, bs)

    return out_flat.reshape(N, Cout, H, W)                          # NCHW


# ---- pure-JAX reference (for correctness check only) --------------------
def resblock_ref(x_nchw, time_emb, p):
    x = jnp.transpose(x_nchw, (0, 2, 3, 1))                  # NHWC
    N, H, W, Cin = x.shape
    Cout = p["w1"].shape[0]
    g1 = min(8, Cin)
    g2 = min(8, Cout)

    def gn(z, gamma, beta, groups):
        n, h, w, c = z.shape
        zg = z.reshape(n, h, w, groups, c // groups)
        mean = zg.mean(axis=(1, 2, 4), keepdims=True)
        var = zg.var(axis=(1, 2, 4), keepdims=True)
        zn = ((zg - mean) / jnp.sqrt(var + 1e-5)).reshape(n, h, w, c)
        return zn * gamma + beta

    def conv3(z, w, b):
        whwio = jnp.transpose(w, (2, 3, 1, 0))
        y = jax.lax.conv_general_dilated(
            z, whwio, (1, 1), "SAME",
            dimension_numbers=("NHWC", "HWIO", "NHWC"))
        return y + b

    h = gn(x, p["gn1_g"], p["gn1_b"], g1)
    h = h * jax.nn.sigmoid(h)
    h = conv3(h, p["w1"], p["b1"])
    t = time_emb @ p["wt"] + p["bt"]
    h = h + t[:, None, None, :]
    h = gn(h, p["gn2_g"], p["gn2_b"], g2)
    h = h * jax.nn.sigmoid(h)
    h = conv3(h, p["w2"], p["b2"])
    ws = jnp.transpose(p["ws"][:, :, 0, 0], (1, 0))
    sc = (x.reshape(N * H * W, Cin) @ ws + p["bs"]).reshape(N, H, W, Cout)
    return jnp.transpose(h + sc, (0, 3, 1, 2))


if __name__ == "__main__":
    N, Cin, Cout, T, H, W = 2, 16, 32, 32, 16, 16

    key = jax.random.PRNGKey(0)
    ks = jax.random.split(key, 14)
    params = {
        "gn1_g": 1.0 + 0.1 * jax.random.normal(ks[0], (Cin,), jnp.float32),
        "gn1_b": 0.1 * jax.random.normal(ks[1], (Cin,), jnp.float32),
        "w1": 0.1 * jax.random.normal(ks[2], (Cout, Cin, 3, 3), jnp.float32),
        "b1": 0.1 * jax.random.normal(ks[3], (Cout,), jnp.float32),
        "wt": 0.1 * jax.random.normal(ks[4], (T, Cout), jnp.float32),
        "bt": 0.1 * jax.random.normal(ks[5], (Cout,), jnp.float32),
        "gn2_g": 1.0 + 0.1 * jax.random.normal(ks[6], (Cout,), jnp.float32),
        "gn2_b": 0.1 * jax.random.normal(ks[7], (Cout,), jnp.float32),
        "w2": 0.1 * jax.random.normal(ks[8], (Cout, Cout, 3, 3), jnp.float32),
        "b2": 0.1 * jax.random.normal(ks[9], (Cout,), jnp.float32),
        "ws": 0.1 * jax.random.normal(ks[10], (Cout, Cin, 1, 1), jnp.float32),
        "bs": 0.1 * jax.random.normal(ks[11], (Cout,), jnp.float32),
    }
    x = jax.random.normal(ks[12], (N, Cin, H, W), jnp.float32)
    time_emb = jax.random.normal(ks[13], (N, T), jnp.float32)

    out = resblock_pallas(x, time_emb, params)
    out = jax.block_until_ready(out)

    ref = jax.block_until_ready(resblock_ref(x, time_emb, params))
    max_err = float(jnp.max(jnp.abs(out - ref)))
    if not bool(jnp.allclose(out, ref, atol=3e-2, rtol=3e-2)):
        raise AssertionError(f"Pallas ResBlock mismatch, max abs err = {max_err}")

    print("KERNEL_OK")
</pallas_src>

<mosaic_0001>
module attributes {stable_mosaic.version = 11 : i64} {
  func.func @kernel(%arg0: i32, %arg1: memref<1x16x256xf32, #tpu.memory_space<vmem>>, %arg2: memref<1x32x1xf32, #tpu.memory_space<vmem>>, %arg3: memref<9x256xf32, #tpu.memory_space<vmem>>, %arg4: memref<16x1xf32, #tpu.memory_space<vmem>>, %arg5: memref<16x1xf32, #tpu.memory_space<vmem>>, %arg6: memref<16x16xf32, #tpu.memory_space<vmem>>, %arg7: memref<32x144xbf16, #tpu.memory_space<vmem>>, %arg8: memref<32x1xf32, #tpu.memory_space<vmem>>, %arg9: memref<32x1xf32, #tpu.memory_space<vmem>>, %arg10: memref<32x1xf32, #tpu.memory_space<vmem>>, %arg11: memref<32x32xf32, #tpu.memory_space<vmem>>, %arg12: memref<32x288xbf16, #tpu.memory_space<vmem>>, %arg13: memref<32x1xf32, #tpu.memory_space<vmem>>, %arg14: memref<32x16xbf16, #tpu.memory_space<vmem>>, %arg15: memref<32x1xf32, #tpu.memory_space<vmem>>, %arg16: memref<1x32x256xf32, #tpu.memory_space<vmem>>) attributes {dimension_semantics = [#tpu.dimension_semantics<parallel>], iteration_bounds = array<i64: 2>, scalar_prefetch = 0 : i64, scratch_operands = 0 : i64, tpu.core_type = #tpu.core_type<tc>, window_params = [{transform_indices = @transform_0, window_bounds = array<i64: 1, 16, 256>}, {transform_indices = @transform_1, window_bounds = array<i64: 1, 32, 1>}, {pipeline_mode = #tpu.pipeline_mode<synchronous>, transform_indices = @transform_2, window_bounds = array<i64: 9, 256>}, {pipeline_mode = #tpu.pipeline_mode<synchronous>, transform_indices = @transform_3, window_bounds = array<i64: 16, 1>}, {pipeline_mode = #tpu.pipeline_mode<synchronous>, transform_indices = @transform_4, window_bounds = array<i64: 16, 1>}, {pipeline_mode = #tpu.pipeline_mode<synchronous>, transform_indices = @transform_5, window_bounds = array<i64: 16, 16>}, {pipeline_mode = #tpu.pipeline_mode<synchronous>, transform_indices = @transform_6, window_bounds = array<i64: 32, 144>}, {pipeline_mode = #tpu.pipeline_mode<synchronous>, transform_indices = @transform_7, window_bounds = array<i64: 32, 1>}, {pipeline_mode = #tpu.pipeline_mode<synchronous>, transform_indices = @transform_8, window_bounds = array<i64: 32, 1>}, {pipeline_mode = #tpu.pipeline_mode<synchronous>, transform_indices = @transform_9, window_bounds = array<i64: 32, 1>}, {pipeline_mode = #tpu.pipeline_mode<synchronous>, transform_indices = @transform_10, window_bounds = array<i64: 32, 32>}, {pipeline_mode = #tpu.pipeline_mode<synchronous>, transform_indices = @transform_11, window_bounds = array<i64: 32, 288>}, {pipeline_mode = #tpu.pipeline_mode<synchronous>, transform_indices = @transform_12, window_bounds = array<i64: 32, 1>}, {pipeline_mode = #tpu.pipeline_mode<synchronous>, transform_indices = @transform_13, window_bounds = array<i64: 32, 16>}, {pipeline_mode = #tpu.pipeline_mode<synchronous>, transform_indices = @transform_14, window_bounds = array<i64: 32, 1>}, {transform_indices = @transform_15, window_bounds = array<i64: 1, 32, 256>}]} {
    %c0 = arith.constant 0 : index
    %c0_0 = arith.constant 0 : index
    %c0_1 = arith.constant 0 : index
    %0 = vector.load %arg1[%c0, %c0_0, %c0_1] : memref<1x16x256xf32, #tpu.memory_space<vmem>>, vector<1x16x256xf32>
    %1 = vector.shape_cast %0 : vector<1x16x256xf32> to vector<16x256xf32>
    %c0_2 = arith.constant 0 : index
    %c0_3 = arith.constant 0 : index
    %2 = vector.load %arg3[%c0_2, %c0_3] : memref<9x256xf32, #tpu.memory_space<vmem>>, vector<9x256xf32>
    %c0_4 = arith.constant 0 : index
    %c0_5 = arith.constant 0 : index
    %3 = vector.load %arg4[%c0_4, %c0_5] : memref<16x1xf32, #tpu.memory_space<vmem>>, vector<16x1xf32>
    %c0_6 = arith.constant 0 : index
    %c0_7 = arith.constant 0 : index
    %4 = vector.load %arg5[%c0_6, %c0_7] : memref<16x1xf32, #tpu.memory_space<vmem>>, vector<16x1xf32>
    %c0_8 = arith.constant 0 : index
    %c0_9 = arith.constant 0 : index
    %5 = vector.load %arg6[%c0_8, %c0_9] : memref<16x16xf32, #tpu.memory_space<vmem>>, vector<16x16xf32>
    %cst = arith.constant dense<0.000000e+00> : vector<16xf32>
    %6 = vector.multi_reduction <add>, %1, %cst [1] : vector<16x256xf32> to vector<16xf32>
    %7 = vector.shape_cast %6 : vector<16xf32> to vector<16x1xf32>
    %8 = arith.mulf %1, %1 : vector<16x256xf32>
    %cst_10 = arith.constant dense<0.000000e+00> : vector<16xf32>
    %9 = vector.multi_reduction <add>, %8, %cst_10 [1] : vector<16x256xf32> to vector<16xf32>
    %10 = vector.shape_cast %9 : vector<16xf32> to vector<16x1xf32>
    %11 = tpu.concatenate %7, %10 in 1 : vector<16x1xf32>, vector<16x1xf32> -> vector<16x2xf32>
    %cst_11 = arith.constant dense<0.000000e+00> : vector<16x2xf32>
    %12 = tpu.matmul %5, %11, %cst_11 {dimension_numbers = #tpu.dot_dimension_numbers<[1], [0], [0], [1], [0, 0, 1, 1], [], []>} : vector<16x16xf32>, vector<16x2xf32>, vector<16x2xf32> -> vector<16x2xf32>
    %13 = vector.extract_strided_slice %12 {offsets = [0, 0], sizes = [16, 1], strides = [1, 1]} : vector<16x2xf32> to vector<16x1xf32>
    %cst_12 = arith.constant 5.120000e+02 : f32
    %14 = vector.broadcast %cst_12 : f32 to vector<16x1xf32>
    %15 = arith.divf %13, %14 : vector<16x1xf32>
    %16 = vector.extract_strided_slice %12 {offsets = [0, 1], sizes = [16, 1], strides = [1, 1]} : vector<16x2xf32> to vector<16x1xf32>
    %cst_13 = arith.constant 5.120000e+02 : f32
    %17 = vector.broadcast %cst_13 : f32 to vector<16x1xf32>
    %18 = arith.divf %16, %17 : vector<16x1xf32>
    %19 = arith.mulf %15, %15 : vector<16x1xf32>
    %20 = arith.subf %18, %19 : vector<16x1xf32>
    %cst_14 = arith.constant 9.99999974E-6 : f32
    %21 = vector.broadcast %cst_14 : f32 to vector<16x1xf32>
    %22 = arith.addf %20, %21 : vector<16x1xf32>
    %23 = math.rsqrt %22 : vector<16x1xf32>
    %24 = vector.broadcast %15 : vector<16x1xf32> to vector<16x256xf32>
    %25 = arith.subf %1, %24 : vector<16x256xf32>
    %26 = vector.broadcast %23 : vector<16x1xf32> to vector<16x256xf32>
    %27 = arith.mulf %25, %26 : vector<16x256xf32>
    %28 = vector.broadcast %3 : vector<16x1xf32> to vector<16x256xf32>
    %29 = arith.mulf %27, %28 : vector<16x256xf32>
    %30 = vector.broadcast %4 : vector<16x1xf32> to vector<16x256xf32>
    %31 = arith.addf %29, %30 : vector<16x256xf32>
    %32 = arith.negf %31 : vector<16x256xf32>
    %33 = math.exp %32 : vector<16x256xf32>
    %cst_15 = arith.constant 1.000000e+00 : f32
    %34 = vector.broadcast %cst_15 : f32 to vector<16x256xf32>
    %35 = arith.addf %34, %33 : vector<16x256xf32>
    %36 = arith.divf %34, %35 : vector<16x256xf32>
    %37 = arith.mulf %31, %36 : vector<16x256xf32>
    %c0_16 = arith.constant 0 : index
    %c0_17 = arith.constant 0 : index
    %38 = vector.load %arg8[%c0_16, %c0_17] : memref<32x1xf32, #tpu.memory_space<vmem>>, vector<32x1xf32>
    %c17_i32 = arith.constant 17 : i32
    %39 = tpu.dynamic_rotate %37 by %c17_i32 dim 1 : vector<16x256xf32>, i32 -> vector<16x256xf32>
    %40 = vector.extract_strided_slice %2 {offsets = [0, 0], sizes = [1, 256], strides = [1, 1]} : vector<9x256xf32> to vector<1x256xf32>
    %41 = vector.broadcast %40 : vector<1x256xf32> to vector<16x256xf32>
    %42 = arith.mulf %39, %41 : vector<16x256xf32>
    %43 = arith.truncf %42 : vector<16x256xf32> to vector<16x256xbf16>
    %c16_i32 = arith.constant 16 : i32
    %44 = tpu.dynamic_rotate %37 by %c16_i32 dim 1 : vector<16x256xf32>, i32 -> vector<16x256xf32>
    %45 = vector.extract_strided_slice %2 {offsets = [1, 0], sizes = [1, 256], strides = [1, 1]} : vector<9x256xf32> to vector<1x256xf32>
    %46 = vector.broadcast %45 : vector<1x256xf32> to vector<16x256xf32>
    %47 = arith.mulf %44, %46 : vector<16x256xf32>
    %48 = arith.truncf %47 : vector<16x256xf32> to vector<16x256xbf16>
    %c15_i32 = arith.constant 15 : i32
    %49 = tpu.dynamic_rotate %37 by %c15_i32 dim 1 : vector<16x256xf32>, i32 -> vector<16x256xf32>
    %50 = vector.extract_strided_slice %2 {offsets = [2, 0], sizes = [1, 256], strides = [1, 1]} : vector<9x256xf32> to vector<1x256xf32>
    %51 = vector.broadcast %50 : vector<1x256xf32> to vector<16x256xf32>
    %52 = arith.mulf %49, %51 : vector<16x256xf32>
    %53 = arith.truncf %52 : vector<16x256xf32> to vector<16x256xbf16>
    %c1_i32 = arith.constant 1 : i32
    %54 = tpu.dynamic_rotate %37 by %c1_i32 dim 1 : vector<16x256xf32>, i32 -> vector<16x256xf32>
    %55 = vector.extract_strided_slice %2 {offsets = [3, 0], sizes = [1, 256], strides = [1, 1]} : vector<9x256xf32> to vector<1x256xf32>
    %56 = vector.broadcast %55 : vector<1x256xf32> to vector<16x256xf32>
    %57 = arith.mulf %54, %56 : vector<16x256xf32>
    %58 = arith.truncf %57 : vector<16x256xf32> to vector<16x256xbf16>
    %59 = vector.extract_strided_slice %2 {offsets = [4, 0], sizes = [1, 256], strides = [1, 1]} : vector<9x256xf32> to vector<1x256xf32>
    %60 = vector.broadcast %59 : vector<1x256xf32> to vector<16x256xf32>
    %61 = arith.mulf %37, %60 : vector<16x256xf32>
    %62 = arith.truncf %61 : vector<16x256xf32> to vector<16x256xbf16>
    %c255_i32 = arith.constant 255 : i32
    %63 = tpu.dynamic_rotate %37 by %c255_i32 dim 1 : vector<16x256xf32>, i32 -> vector<16x256xf32>
    %64 = vector.extract_strided_slice %2 {offsets = [5, 0], sizes = [1, 256], strides = [1, 1]} : vector<9x256xf32> to vector<1x256xf32>
    %65 = vector.broadcast %64 : vector<1x256xf32> to vector<16x256xf32>
    %66 = arith.mulf %63, %65 : vector<16x256xf32>
    %67 = arith.truncf %66 : vector<16x256xf32> to vector<16x256xbf16>
    %c241_i32 = arith.constant 241 : i32
    %68 = tpu.dynamic_rotate %37 by %c241_i32 dim 1 : vector<16x256xf32>, i32 -> vector<16x256xf32>
    %69 = vector.extract_strided_slice %2 {offsets = [6, 0], sizes = [1, 256], strides = [1, 1]} : vector<9x256xf32> to vector<1x256xf32>
    %70 = vector.broadcast %69 : vector<1x256xf32> to vector<16x256xf32>
    %71 = arith.mulf %68, %70 : vector<16x256xf32>
    %72 = arith.truncf %71 : vector<16x256xf32> to vector<16x256xbf16>
    %c240_i32 = arith.constant 240 : i32
    %73 = tpu.dynamic_rotate %37 by %c240_i32 dim 1 : vector<16x256xf32>, i32 -> vector<16x256xf32>
    %74 = vector.extract_strided_slice %2 {offsets = [7, 0], sizes = [1, 256], strides = [1, 1]} : vector<9x256xf32> to vector<1x256xf32>
    %75 = vector.broadcast %74 : vector<1x256xf32> to vector<16x256xf32>
    %76 = arith.mulf %73, %75 : vector<16x256xf32>
    %77 = arith.truncf %76 : vector<16x256xf32> to vector<16x256xbf16>
    %c239_i32 = arith.constant 239 : i32
    %78 = tpu.dynamic_rotate %37 by %c239_i32 dim 1 : vector<16x256xf32>, i32 -> vector<16x256xf32>
    %79 = vector.extract_strided_slice %2 {offsets = [8, 0], sizes = [1, 256], strides = [1, 1]} : vector<9x256xf32> to vector<1x256xf32>
    %80 = vector.broadcast %79 : vector<1x256xf32> to vector<16x256xf32>
    %81 = arith.mulf %78, %80 : vector<16x256xf32>
    %82 = arith.truncf %81 : vector<16x256xf32> to vector<16x256xbf16>
    %83 = tpu.concatenate %43, %48, %53, %58, %62, %67, %72, %77, %82 in 0 : vector<16x256xbf16>, vector<16x256xbf16>, vector<16x256xbf16>, vector<16x256xbf16>, vector<16x256xbf16>, vector<16x256xbf16>, vector<16x256xbf16>, vector<16x256xbf16>, vector<16x256xbf16> -> vector<144x256xbf16>
    %c0_18 = arith.constant 0 : index
    %c0_19 = arith.constant 0 : index
    %84 = vector.load %arg7[%c0_18, %c0_19] : memref<32x144xbf16, #tpu.memory_space<vmem>>, vector<32x144xbf16>
    %cst_20 = arith.constant dense<0.000000e+00> : vector<32x256xf32>
    %85 = tpu.matmul %84, %83, %cst_20 {dimension_numbers = #tpu.dot_dimension_numbers<[1], [0], [0], [1], [0, 0, 1, 1], [], []>} : vector<32x144xbf16>, vector<144x256xbf16>, vector<32x256xf32> -> vector<32x256xf32>
    %86 = vector.broadcast %38 : vector<32x1xf32> to vector<32x256xf32>
    %87 = arith.addf %85, %86 : vector<32x256xf32>
    %c0_21 = arith.constant 0 : index
    %c0_22 = arith.constant 0 : index
    %c0_23 = arith.constant 0 : index
    %88 = vector.load %arg2[%c0_21, %c0_22, %c0_23] : memref<1x32x1xf32, #tpu.memory_space<vmem>>, vector<1x32x1xf32>
    %89 = vector.shape_cast %88 : vector<1x32x1xf32> to vector<32x1xf32>
    %90 = vector.broadcast %89 : vector<32x1xf32> to vector<32x256xf32>
    %91 = arith.addf %87, %90 : vector<32x256xf32>
    %c0_24 = arith.constant 0 : index
    %c0_25 = arith.constant 0 : index
    %92 = vector.load %arg9[%c0_24, %c0_25] : memref<32x1xf32, #tpu.memory_space<vmem>>, vector<32x1xf32>
    %c0_26 = arith.constant 0 : index
    %c0_27 = arith.constant 0 : index
    %93 = vector.load %arg10[%c0_26, %c0_27] : memref<32x1xf32, #tpu.memory_space<vmem>>, vector<32x1xf32>
    %c0_28 = arith.constant 0 : index
    %c0_29 = arith.constant 0 : index
    %94 = vector.load %arg11[%c0_28, %c0_29] : memref<32x32xf32, #tpu.memory_space<vmem>>, vector<32x32xf32>
    %cst_30 = arith.constant dense<0.000000e+00> : vector<32xf32>
    %95 = vector.multi_reduction <add>, %91, %cst_30 [1] : vector<32x256xf32> to vector<32xf32>
    %96 = vector.shape_cast %95 : vector<32xf32> to vector<32x1xf32>
    %97 = arith.mulf %91, %91 : vector<32x256xf32>
    %cst_31 = arith.constant dense<0.000000e+00> : vector<32xf32>
    %98 = vector.multi_reduction <add>, %97, %cst_31 [1] : vector<32x256xf32> to vector<32xf32>
    %99 = vector.shape_cast %98 : vector<32xf32> to vector<32x1xf32>
    %100 = tpu.concatenate %96, %99 in 1 : vector<32x1xf32>, vector<32x1xf32> -> vector<32x2xf32>
    %cst_32 = arith.constant dense<0.000000e+00> : vector<32x2xf32>
    %101 = tpu.matmul %94, %100, %cst_32 {dimension_numbers = #tpu.dot_dimension_numbers<[1], [0], [0], [1], [0, 0, 1, 1], [], []>} : vector<32x32xf32>, vector<32x2xf32>, vector<32x2xf32> -> vector<32x2xf32>
    %102 = vector.extract_strided_slice %101 {offsets = [0, 0], sizes = [32, 1], strides = [1, 1]} : vector<32x2xf32> to vector<32x1xf32>
    %cst_33 = arith.constant 1.024000e+03 : f32
    %103 = vector.broadcast %cst_33 : f32 to vector<32x1xf32>
    %104 = arith.divf %102, %103 : vector<32x1xf32>
    %105 = vector.extract_strided_slice %101 {offsets = [0, 1], sizes = [32, 1], strides = [1, 1]} : vector<32x2xf32> to vector<32x1xf32>
    %cst_34 = arith.constant 1.024000e+03 : f32
    %106 = vector.broadcast %cst_34 : f32 to vector<32x1xf32>
    %107 = arith.divf %105, %106 : vector<32x1xf32>
    %108 = arith.mulf %104, %104 : vector<32x1xf32>
    %109 = arith.subf %107, %108 : vector<32x1xf32>
    %cst_35 = arith.constant 9.99999974E-6 : f32
    %110 = vector.broadcast %cst_35 : f32 to vector<32x1xf32>
    %111 = arith.addf %109, %110 : vector<32x1xf32>
    %112 = math.rsqrt %111 : vector<32x1xf32>
    %113 = vector.broadcast %104 : vector<32x1xf32> to vector<32x256xf32>
    %114 = arith.subf %91, %113 : vector<32x256xf32>
    %115 = vector.broadcast %112 : vector<32x1xf32> to vector<32x256xf32>
    %116 = arith.mulf %114, %115 : vector<32x256xf32>
    %117 = vector.broadcast %92 : vector<32x1xf32> to vector<32x256xf32>
    %118 = arith.mulf %116, %117 : vector<32x256xf32>
    %119 = vector.broadcast %93 : vector<32x1xf32> to vector<32x256xf32>
    %120 = arith.addf %118, %119 : vector<32x256xf32>
    %121 = arith.negf %120 : vector<32x256xf32>
    %122 = math.exp %121 : vector<32x256xf32>
    %cst_36 = arith.constant 1.000000e+00 : f32
    %123 = vector.broadcast %cst_36 : f32 to vector<32x256xf32>
    %124 = arith.addf %123, %122 : vector<32x256xf32>
    %125 = arith.divf %123, %124 : vector<32x256xf32>
    %126 = arith.mulf %120, %125 : vector<32x256xf32>
    %c0_37 = arith.constant 0 : index
    %c0_38 = arith.constant 0 : index
    %127 = vector.load %arg13[%c0_37, %c0_38] : memref<32x1xf32, #tpu.memory_space<vmem>>, vector<32x1xf32>
    %c17_i32_39 = arith.constant 17 : i32
    %128 = tpu.dynamic_rotate %126 by %c17_i32_39 dim 1 : vector<32x256xf32>, i32 -> vector<32x256xf32>
    %129 = vector.extract_strided_slice %2 {offsets = [0, 0], sizes = [1, 256], strides = [1, 1]} : vector<9x256xf32> to vector<1x256xf32>
    %130 = vector.broadcast %129 : vector<1x256xf32> to vector<32x256xf32>
    %131 = arith.mulf %128, %130 : vector<32x256xf32>
    %132 = arith.truncf %131 : vector<32x256xf32> to vector<32x256xbf16>
    %c16_i32_40 = arith.constant 16 : i32
    %133 = tpu.dynamic_rotate %126 by %c16_i32_40 dim 1 : vector<32x256xf32>, i32 -> vector<32x256xf32>
    %134 = vector.extract_strided_slice %2 {offsets = [1, 0], sizes = [1, 256], strides = [1, 1]} : vector<9x256xf32> to vector<1x256xf32>
    %135 = vector.broadcast %134 : vector<1x256xf32> to vector<32x256xf32>
    %136 = arith.mulf %133, %135 : vector<32x256xf32>
    %137 = arith.truncf %136 : vector<32x256xf32> to vector<32x256xbf16>
    %c15_i32_41 = arith.constant 15 : i32
    %138 = tpu.dynamic_rotate %126 by %c15_i32_41 dim 1 : vector<32x256xf32>, i32 -> vector<32x256xf32>
    %139 = vector.extract_strided_slice %2 {offsets = [2, 0], sizes = [1, 256], strides = [1, 1]} : vector<9x256xf32> to vector<1x256xf32>
    %140 = vector.broadcast %139 : vector<1x256xf32> to vector<32x256xf32>
    %141 = arith.mulf %138, %140 : vector<32x256xf32>
    %142 = arith.truncf %141 : vector<32x256xf32> to vector<32x256xbf16>
    %c1_i32_42 = arith.constant 1 : i32
    %143 = tpu.dynamic_rotate %126 by %c1_i32_42 dim 1 : vector<32x256xf32>, i32 -> vector<32x256xf32>
    %144 = vector.extract_strided_slice %2 {offsets = [3, 0], sizes = [1, 256], strides = [1, 1]} : vector<9x256xf32> to vector<1x256xf32>
    %145 = vector.broadcast %144 : vector<1x256xf32> to vector<32x256xf32>
    %146 = arith.mulf %143, %145 : vector<32x256xf32>
    %147 = arith.truncf %146 : vector<32x256xf32> to vector<32x256xbf16>
    %148 = vector.extract_strided_slice %2 {offsets = [4, 0], sizes = [1, 256], strides = [1, 1]} : vector<9x256xf32> to vector<1x256xf32>
    %149 = vector.broadcast %148 : vector<1x256xf32> to vector<32x256xf32>
    %150 = arith.mulf %126, %149 : vector<32x256xf32>
    %151 = arith.truncf %150 : vector<32x256xf32> to vector<32x256xbf16>
    %c255_i32_43 = arith.constant 255 : i32
    %152 = tpu.dynamic_rotate %126 by %c255_i32_43 dim 1 : vector<32x256xf32>, i32 -> vector<32x256xf32>
    %153 = vector.extract_strided_slice %2 {offsets = [5, 0], sizes = [1, 256], strides = [1, 1]} : vector<9x256xf32> to vector<1x256xf32>
    %154 = vector.broadcast %153 : vector<1x256xf32> to vector<32x256xf32>
    %155 = arith.mulf %152, %154 : vector<32x256xf32>
    %156 = arith.truncf %155 : vector<32x256xf32> to vector<32x256xbf16>
    %c241_i32_44 = arith.constant 241 : i32
    %157 = tpu.dynamic_rotate %126 by %c241_i32_44 dim 1 : vector<32x256xf32>, i32 -> vector<32x256xf32>
    %158 = vector.extract_strided_slice %2 {offsets = [6, 0], sizes = [1, 256], strides = [1, 1]} : vector<9x256xf32> to vector<1x256xf32>
    %159 = vector.broadcast %158 : vector<1x256xf32> to vector<32x256xf32>
    %160 = arith.mulf %157, %159 : vector<32x256xf32>
    %161 = arith.truncf %160 : vector<32x256xf32> to vector<32x256xbf16>
    %c240_i32_45 = arith.constant 240 : i32
    %162 = tpu.dynamic_rotate %126 by %c240_i32_45 dim 1 : vector<32x256xf32>, i32 -> vector<32x256xf32>
    %163 = vector.extract_strided_slice %2 {offsets = [7, 0], sizes = [1, 256], strides = [1, 1]} : vector<9x256xf32> to vector<1x256xf32>
    %164 = vector.broadcast %163 : vector<1x256xf32> to vector<32x256xf32>
    %165 = arith.mulf %162, %164 : vector<32x256xf32>
    %166 = arith.truncf %165 : vector<32x256xf32> to vector<32x256xbf16>
    %c239_i32_46 = arith.constant 239 : i32
    %167 = tpu.dynamic_rotate %126 by %c239_i32_46 dim 1 : vector<32x256xf32>, i32 -> vector<32x256xf32>
    %168 = vector.extract_strided_slice %2 {offsets = [8, 0], sizes = [1, 256], strides = [1, 1]} : vector<9x256xf32> to vector<1x256xf32>
    %169 = vector.broadcast %168 : vector<1x256xf32> to vector<32x256xf32>
    %170 = arith.mulf %167, %169 : vector<32x256xf32>
    %171 = arith.truncf %170 : vector<32x256xf32> to vector<32x256xbf16>
    %172 = tpu.concatenate %132, %137, %142, %147, %151, %156, %161, %166, %171 in 0 : vector<32x256xbf16>, vector<32x256xbf16>, vector<32x256xbf16>, vector<32x256xbf16>, vector<32x256xbf16>, vector<32x256xbf16>, vector<32x256xbf16>, vector<32x256xbf16>, vector<32x256xbf16> -> vector<288x256xbf16>
    %c0_47 = arith.constant 0 : index
    %c0_48 = arith.constant 0 : index
    %173 = vector.load %arg12[%c0_47, %c0_48] : memref<32x288xbf16, #tpu.memory_space<vmem>>, vector<32x288xbf16>
    %cst_49 = arith.constant dense<0.000000e+00> : vector<32x256xf32>
    %174 = tpu.matmul %173, %172, %cst_49 {dimension_numbers = #tpu.dot_dimension_numbers<[1], [0], [0], [1], [0, 0, 1, 1], [], []>} : vector<32x288xbf16>, vector<288x256xbf16>, vector<32x256xf32> -> vector<32x256xf32>
    %175 = vector.broadcast %127 : vector<32x1xf32> to vector<32x256xf32>
    %176 = arith.addf %174, %175 : vector<32x256xf32>
    %c0_50 = arith.constant 0 : index
    %c0_51 = arith.constant 0 : index
    %177 = vector.load %arg14[%c0_50, %c0_51] : memref<32x16xbf16, #tpu.memory_space<vmem>>, vector<32x16xbf16>
    %178 = arith.truncf %1 : vector<16x256xf32> to vector<16x256xbf16>
    %cst_52 = arith.constant dense<0.000000e+00> : vector<32x256xf32>
    %179 = tpu.matmul %177, %178, %cst_52 {dimension_numbers = #tpu.dot_dimension_numbers<[1], [0], [0], [1], [0, 0, 1, 1], [], []>} : vector<32x16xbf16>, vector<16x256xbf16>, vector<32x256xf32> -> vector<32x256xf32>
    %c0_53 = arith.constant 0 : index
    %c0_54 = arith.constant 0 : index
    %180 = vector.load %arg15[%c0_53, %c0_54] : memref<32x1xf32, #tpu.memory_space<vmem>>, vector<32x1xf32>
    %181 = vector.broadcast %180 : vector<32x1xf32> to vector<32x256xf32>
    %182 = arith.addf %179, %181 : vector<32x256xf32>
    %183 = arith.addf %176, %182 : vector<32x256xf32>
    %c0_55 = arith.constant 0 : index
    %c0_56 = arith.constant 0 : index
    %c0_57 = arith.constant 0 : index
    %184 = vector.load %arg16[%c0_55, %c0_56, %c0_57] : memref<1x32x256xf32, #tpu.memory_space<vmem>>, vector<1x32x256xf32>
    %185 = vector.shape_cast %184 : vector<1x32x256xf32> to vector<32x256xf32>
    %186 = vector.shape_cast %183 : vector<32x256xf32> to vector<1x32x256xf32>
    tpu.vector_store %arg16[%c0_55, %c0_56, %c0_57], %186 {strides = array<i32>} : memref<1x32x256xf32, #tpu.memory_space<vmem>>, vector<1x32x256xf32>,
    return
  }
  func.func @transform_0(%arg0: i32) -> (i32, i32, i32) {
    %c0_i32 = arith.constant 0 : i32
    %c0_i32_0 = arith.constant 0 : i32
    %c0_i32_1 = arith.constant 0 : i32
    return %arg0, %c0_i32, %c0_i32_0 : i32, i32, i32
  }
  func.func @transform_1(%arg0: i32) -> (i32, i32, i32) {
    %c0_i32 = arith.constant 0 : i32
    %c0_i32_0 = arith.constant 0 : i32
    %c0_i32_1 = arith.constant 0 : i32
    return %arg0, %c0_i32, %c0_i32_0 : i32, i32, i32
  }
  func.func @transform_2(%arg0: i32) -> (i32, i32) {
    %c0_i32 = arith.constant 0 : i32
    %c0_i32_0 = arith.constant 0 : i32
    %c0_i32_1 = arith.constant 0 : i32
    return %c0_i32, %c0_i32_0 : i32, i32
  }
  func.func @transform_3(%arg0: i32) -> (i32, i32) {
    %c0_i32 = arith.constant 0 : i32
    %c0_i32_0 = arith.constant 0 : i32
    %c0_i32_1 = arith.constant 0 : i32
    return %c0_i32, %c0_i32_0 : i32, i32
  }
  func.func @transform_4(%arg0: i32) -> (i32, i32) {
    %c0_i32 = arith.constant 0 : i32
    %c0_i32_0 = arith.constant 0 : i32
    %c0_i32_1 = arith.constant 0 : i32
    return %c0_i32, %c0_i32_0 : i32, i32
  }
  func.func @transform_5(%arg0: i32) -> (i32, i32) {
    %c0_i32 = arith.constant 0 : i32
    %c0_i32_0 = arith.constant 0 : i32
    %c0_i32_1 = arith.constant 0 : i32
    return %c0_i32, %c0_i32_0 : i32, i32
  }
  func.func @transform_6(%arg0: i32) -> (i32, i32) {
    %c0_i32 = arith.constant 0 : i32
    %c0_i32_0 = arith.constant 0 : i32
    %c0_i32_1 = arith.constant 0 : i32
    return %c0_i32, %c0_i32_0 : i32, i32
  }
  func.func @transform_7(%arg0: i32) -> (i32, i32) {
    %c0_i32 = arith.constant 0 : i32
    %c0_i32_0 = arith.constant 0 : i32
    %c0_i32_1 = arith.constant 0 : i32
    return %c0_i32, %c0_i32_0 : i32, i32
  }
  func.func @transform_8(%arg0: i32) -> (i32, i32) {
    %c0_i32 = arith.constant 0 : i32
    %c0_i32_0 = arith.constant 0 : i32
    %c0_i32_1 = arith.constant 0 : i32
    return %c0_i32, %c0_i32_0 : i32, i32
  }
  func.func @transform_9(%arg0: i32) -> (i32, i32) {
    %c0_i32 = arith.constant 0 : i32
    %c0_i32_0 = arith.constant 0 : i32
    %c0_i32_1 = arith.constant 0 : i32
    return %c0_i32, %c0_i32_0 : i32, i32
  }
  func.func @transform_10(%arg0: i32) -> (i32, i32) {
    %c0_i32 = arith.constant 0 : i32
    %c0_i32_0 = arith.constant 0 : i32
    %c0_i32_1 = arith.constant 0 : i32
    return %c0_i32, %c0_i32_0 : i32, i32
  }
  func.func @transform_11(%arg0: i32) -> (i32, i32) {
    %c0_i32 = arith.constant 0 : i32
    %c0_i32_0 = arith.constant 0 : i32
    %c0_i32_1 = arith.constant 0 : i32
    return %c0_i32, %c0_i32_0 : i32, i32
  }
  func.func @transform_12(%arg0: i32) -> (i32, i32) {
    %c0_i32 = arith.constant 0 : i32
    %c0_i32_0 = arith.constant 0 : i32
    %c0_i32_1 = arith.constant 0 : i32
    return %c0_i32, %c0_i32_0 : i32, i32
  }
  func.func @transform_13(%arg0: i32) -> (i32, i32) {
    %c0_i32 = arith.constant 0 : i32
    %c0_i32_0 = arith.constant 0 : i32
    %c0_i32_1 = arith.constant 0 : i32
    return %c0_i32, %c0_i32_0 : i32, i32
  }
  func.func @transform_14(%arg0: i32) -> (i32, i32) {
    %c0_i32 = arith.constant 0 : i32
    %c0_i32_0 = arith.constant 0 : i32
    %c0_i32_1 = arith.constant 0 : i32
    return %c0_i32, %c0_i32_0 : i32, i32
  }
  func.func @transform_15(%arg0: i32) -> (i32, i32, i32) {
    %c0_i32 = arith.constant 0 : i32
    %c0_i32_0 = arith.constant 0 : i32
    %c0_i32_1 = arith.constant 0 : i32
    return %arg0, %c0_i32, %c0_i32_0 : i32, i32, i32
  }
}

</mosaic_0001>

<bundles_post_ra>
// kernel: tpu_custom_call.1
= control target key start
LH: loop header
LB: loop body
LE: loop exit
PB: predicated region body
PF: predicated region fallthrough
CT: control target
= control target key end

     0   :  { %s3645_s0 = inlined_call_operand.vmem [shape: f32[2,16,256], index: 0, kind: input, shape index: {}]   ;;  %s3646_s1 = inlined_call_operand.vmem [shape: f32[2,32,1], index: 1, kind: input, shape index: {}]   ;;  %s3647_s2 = inlined_call_operand.vmem [shape: f32[9,256], index: 2, kind: input, shape index: {}]   ;;  %s3648_s3 = inlined_call_operand.vmem [shape: f32[16,1], index: 3, kind: input, shape index: {}]   ;;  %s3649_s4 = inlined_call_operand.vmem [shape: f32[16,1], index: 4, kind: input, shape index: {}]   ;;  %s3650_s5 = inlined_call_operand.vmem [shape: f32[16,16], index: 5, kind: input, shape index: {}]   ;;  %s3651_s6 = inlined_call_operand.vmem [shape: bf16[32,144], index: 6, kind: input, shape index: {}]   ;;  %s3652_s7 = inlined_call_operand.vmem [shape: f32[32,1], index: 7, kind: input, shape index: {}]   ;;  %s3653_s8 = inlined_call_operand.vmem [shape: f32[32,1], index: 8, kind: input, shape index: {}]   ;;  %s3654_s9 = inlined_call_operand.vmem [shape: f32[32,1], index: 9, kind: input, shape index: {}]   ;;  %s3655_s10 = inlined_call_operand.vmem [shape: f32[32,32], index: 10, kind: input, shape index: {}]   ;;  %s3656_s11 = inlined_call_operand.vmem [shape: bf16[32,288], index: 11, kind: input, shape index: {}]   ;;  %s3657_s12 = inlined_call_operand.vmem [shape: f32[32,1], index: 12, kind: input, shape index: {}]   ;;  %s3658_s13 = inlined_call_operand.vmem [shape: bf16[32,16], index: 13, kind: input, shape index: {}]   ;;  %s3659_s14 = inlined_call_operand.vmem [shape: f32[32,1], index: 14, kind: input, shape index: {}]   ;;  %s3660_s15 = inlined_call_operand.hbm [shape: f32[2,32,256], index: 15, kind: output, shape index: {}]  }
   0x1   :  { %3691 = sst [smem:[#allocation17_spill]] %s3645_s0 }
   0x2   :  { %3692 = sst [smem:[#allocation18_spill]] %s3648_s3 }
   0x3   :  { %3693 = sst [smem:[#allocation19_spill]] %s3649_s4 }
   0x4   :  { %3694 = sst [smem:[#allocation20_spill]] %s3650_s5 }
   0x5   :  { %20 = vsyncpa [#allocation3], 0 }
   0x6   :  { %22 = vsyncpa [#allocation3 + $0x1], 0  ;;  %s2512_s18 = smov 0   ;;  %s2514_s19 = smov 0  }
   0x7   :  { %s2516_s20 = smov 0   ;;  %s2518_s21 = smov 0  }
   0x8 LB: > { %3695 = sst [smem:[#allocation5_spill]] %s2414_s20  ;;  %s2533_s22 = sadd.s32 4294967295, %s2418_s21   ;;  %s2418_s21 = sphi %s2518_s21, %s3746_s21   ;;  %s2414_s20 = sphi %s2516_s20, %s3748_s20   ;;  %s2410_s19 = sphi %s2514_s19, %s3750_s19   ;;  %s2406_s18 = sphi %s2512_s18, %s3749_s18  }
   0x9   : > { %s2129_s23 = sadd.s32 4294967294, %s2418_s21   ;;  %s2537_s24 = sadd.s32 1, %s2418_s21  }
   0xa   : > { %3696 = sst [smem:[#allocation6_spill]] %s2537_s24  ;;  %s360_s25 = sadd.s32 1, %s2414_s20 }
   0xb   : > { %s357_s26 = ssub.s32 %s2418_s21, %s2537_s24  ;;  %p370_p0 = scmp.ne.s32.totalorder %s2414_s20, %s2410_s19 }
   0xc   : > { %p358_p1 = scmp.eq.s32.totalorder %s357_s26, 0  ;;  %p371_p2 = scmp.eq.s32.totalorder %s2533_s22, 1 }
   0xd   : > { %p376_p3 = scmp.ne.s32.totalorder %s2410_s19, %s2406_s18  ;;  %p377_p4 = scmp.eq.s32.totalorder %s2129_s23, 1 }
   0xe   : > { %s2548_s27 = scalar_select %p358_p1, %s2414_s20, %s360_s25  }
   0xf   : > { %p2550_p5 = por %p371_p2, %p370_p0  ;;  %p2554_p6 = por %p377_p4, %p376_p3 }
  0x10   : > { %3697 = sst [smem:[#allocation7_spill]] %s2548_s27  ;;  %p2132_p7 = scmp.ge.s32.totalorder %s2418_s21, 1 }
  0x11   : > { %s3699_s29 = scalar_select %p2554_p6, 1, 0 }
  0x12   : > { %p450_p8 = scmp.lt.s32.totalorder %s2418_s21, 3 }
  0x13   : > { %3700 = sst [smem:[#allocation8_spill]] %s3699_s29 }
  0x14   : > { %p451_p9 = pnand %p2132_p7, %p450_p8 }
  0x16   : > { %454 = sbr.rel (%p451_p9) target bundleno = 2231 (0x8b7), region = 80 }
  0x1b   : > { %p503_p10 = scmp.lt.s32.totalorder %s2533_s22, 1  ;;  %s3701_s0 = sld [smem:[#allocation17_spill]]  ;;  %vm547_vm0 = vcmask 130048   ;;  %vm544_vm1 = vcmask 7168   ;;  %v3680_v20 = vmov 0   ;;  %v2422_v27 = vmov 1  }
  0x1c   : > { %s3702_s5 = sld [smem:[#allocation20_spill]]  ;;  %2267 = vset.pattern.permute.xlu1 %v3680_v20  ;;  %s3662_s26 = smov 1   ;;  %2269 = vset.pattern.permute.xlu0 %v2422_v27  ;;  %vm1149_vm10 = vcmask 261120  }
  0x1d   : > { %s2562_s30 = scalar_select %p503_p10, %s2533_s22, 1 }
  0x1e   : > { %s3703_s3 = sld [smem:[#allocation18_spill]]  ;;  %s3666_s17 = smov 113  }
  0x1f   : > { %s3661_s16 = sshll.u32 %s2562_s30, 5  ;;  %s3704_s4 = sld [smem:[#allocation19_spill]] }
  0x20   : > { %s3672_s23 = smov 16   ;;  %s3713_s24 = smov 16  }
  0x21   : > { %s2570_s25 = scalar_lea.vmem %s3701_s0, %s3661_s16  ;;  %s3668_s16 = smov 112  }
  0x22   : > { %v2573_v0 = vld [vmem:[%s2570_s25 + $0x10] sm:$0xff]  ;;  %v2576_v1 = vld [vmem:[%s2570_s25 + $0x18] sm:$0xff]  ;;  %v2579_v2 = vld [vmem:[%s2570_s25] sm:$0xff]  ;;  %s3664_s0 = smov 127   ;;  %s3714_s29 = smov 17  }
  0x23   : > { %v531_v3 = vadd.f32 %v2576_v1, %v2573_v0  ;;  %v2584_v4 = vld [vmem:[%s2570_s25 + $0x8] sm:$0xff]  ;;  %v536_v5 = vmul.f32 %v2573_v0, %v2573_v0  ;;  %v537_v6 = vmul.f32 %v2576_v1, %v2576_v1  ;;  %v534_v7 = vmul.f32 %v2579_v2, %v2579_v2  ;;  %v526_v12 = vld [vmem:[%s3702_s5] sm:$0xff] }
  0x24   : > { %v528_v8 = vadd.f32 %v2584_v4, %v2579_v2  ;;  %v535_v9 = vmul.f32 %v2584_v4, %v2584_v4  ;;  %2200 = vmatprep.mubr.msk.f32.mxu1 %vm547_vm0, %v526_v12  ;;  %v527_v19 = vld [vmem:[%s3702_s5 + $0x8] sm:$0xff]  ;;  %v522_v28 = vld [vmem:[%s3703_s3] sm:$0xff]  ;;  %v744_v12 = vlaneseq  ;;  %s3706_s5 = smov 1  }
  0x25   : > { %532 = vadd.xlane.f32.xlu0 %v531_v3  ;;  %v541_v10 = vadd.f32 %v537_v6, %v536_v5  ;;  %v524_v37 = vld [vmem:[%s3704_s4] sm:$0xff]  ;;  %v523_v38 = vld [vmem:[%s3703_s3 + $0x8] sm:$0xff] }
  0x26   : > { %529 = vadd.xlane.f32.xlu1 %v528_v8  ;;  %v538_v11 = vadd.f32 %v535_v9, %v534_v7  ;;  %v525_v39 = vld [vmem:[%s3704_s4 + $0x8] sm:$0xff]  ;;  %s3707_s4 = sshll.u32 %s2562_s30, 5  ;;  %s3715_s30 = smov 112  }
  0x27   : > { %s512_s20 = scalar_lea.vmem %s3646_s1, %s3707_s4 }
  0x29   : > { %542 = vadd.xlane.f32.xlu0 %v541_v10 }
  0x2a   : > { %539 = vadd.xlane.f32.xlu1 %v538_v11 }
  0xae   : > { %v533_v13 = vpop.xlane.xlu0 %532 }
  0xaf   : > { %v530_v14 = vpop.xlane.xlu1 %529 }
  0xb2   : > { %v543_v15 = vpop.xlane.xlu0 %542 }
  0xb3   : > { %v540_v16 = vpop.xlane.xlu1 %539  ;;  %v546_v17 = vsel %vm544_vm1, %v533_v13, %v543_v15  ;;  %v2630_v13 = vshrl.u32 %v744_v12, 7  ;;  %v2636_v15 = vld [vmem:[%s3647_s2] sm:$0xff] }
  0xb4   : > { %2196 = vmatprep.subr.mxu1 %v546_v17  ;;  %v545_v18 = vsel %vm544_vm1, %v530_v14, %v540_v16 }
  0xb5   : > { %2197 = vmatpush3.msra.mxu1 %v546_v17  ;;  %v848_v14 = vsub.s32 4, %v2630_v13  ;;  %v2641_v17 = vld [vmem:[%s3647_s2 + $0x8] sm:$0xff] }
  0xb6   : > { %2198 = vmatprep.subr.mxu1 %v545_v18 }
  0xb7   : > { %2199 = vmatpush3.msra.mxu1 %v545_v18 }
  0xb8   : > { %2201 = vmatmul.mubr.msk.f32.vlgmr.msra.gmra.mxu1 %vm547_vm0, %v527_v19 }
 0x178   : > { %v2202_v21 = vpop.f32.mrf.mxu1 }
 0x179   : > { %v631_v22 = vmul.f32 0.001953125, %v2202_v21  ;;  %v2644_v21 = vrot.slane %v2636_v15, %v848_v14 }
 0x17a   : > { %v620_v23 = vpop.f32.mrf.mxu1 }
 0x17b   : > { %v630_v24 = vmul.f32 0.001953125, %v620_v23  ;;  %v633_v25 = vmul.f32 %v631_v22, %v631_v22  ;;  %3705 = vst [vmem:[#allocation9_spill] sm:$0xff] %v2644_v21 }
 0x17d   : > { %638 = vrot.lane.b32.xlu1 %v633_v25, %s3662_s26  ;;  %v632_v26 = vmul.f32 %v630_v24, %v630_v24 }
 0x17f   : > { %636 = vrot.lane.b32.xlu0 %v632_v26, %s3662_s26  ;;  %s3670_s26 = smov 15  }
 0x181   : > { %650 = vperm.xlu1 %2267, %v630_v24  }
 0x185   : > { %655 = vperm.xlu1 %2267, %v631_v22  }
 0x189   : > { %678 = vperm.xlu1 %2267, %v522_v28  }
 0x18d   : > { %2268 = vset.pattern.permute.xlu1 %v2422_v27 }
 0x1ef   : > { %v639_v29 = vpop.permute.xlu1 %638 }
 0x1f0   : > { %v643_v30 = vsub.f32 %v631_v22, %v639_v29 }
 0x1f1   : > { %v637_v31 = vpop.permute.xlu0 %636 }
 0x1f2   : > { %v645_v32 = vadd.f32 1e-05, %v643_v30  ;;  %v642_v33 = vsub.f32 %v630_v24, %v637_v31  ;;  %v2648_v24 = vrot.slane %v2641_v17, %v848_v14 }
 0x1f4   : > { %2292 = vrsqrt.f32 %v645_v32  ;;  %v644_v34 = vadd.f32 1e-05, %v642_v33 }
 0x1f6   : > { %2294 = vrsqrt.f32 %v644_v34 }
 0x1fc   : > { %v651_v40 = vpop.permute.xlu1 %650 }
 0x1fd   : > { %v658_v44 = vsub.f32 %v2579_v2, %v651_v40  ;;  %v659_v45 = vsub.f32 %v2584_v4, %v651_v40  ;;  %v1071_v40 = vld [vmem:[%s512_s20 + $0x10] sm:$0xff] }
 0x200   : > { %v656_v41 = vpop.permute.xlu1 %655 }
 0x201   : > { %v2293_v35 = vpop.eup %2292  ;;  %v660_v49 = vsub.f32 %v2573_v0, %v656_v41  ;;  %v661_v50 = vsub.f32 %v2576_v1, %v656_v41  ;;  %v732_v41 = vld [vmem:[%s3652_s7] sm:$0xff] }
 0x202   : > { %669 = vperm.xlu1 %2268, %v2293_v35   ;;  %v2276_v35 = vld [vmem:[%s3651_s6 + $0x4] ss:$8 sps:$4 sm:$0xff]  }
 0x203   : > { %v2295_v36 = vpop.eup %2294  ;;  %2150 = vmatprep.mubr.msk.bf16.mxu1 %vm547_vm0, %v2276_v35 }
 0x204   : > { %664 = vperm.xlu0 %2269, %v2295_v36   ;;  %v679_v42 = vpop.permute.xlu1 %678  ;;  %v735_v36 = vld [vmem:[%s3652_s7 + $0x18] sm:$0xff] }
 0x206   : > { %2271 = vset.pattern.permute.xlu1 %v3680_v20 }
 0x207   : > { %692 = vperm.xlu1 %2271, %v524_v37   ;;  %v734_v37 = vld [vmem:[%s3652_s7 + $0x10] sm:$0xff] }
 0x208   : > { %2270 = vset.pattern.permute.xlu0 %v3680_v20 }
 0x209   : > { %683 = vperm.xlu0 %2270, %v523_v38   ;;  %v1072_v38 = vld [vmem:[%s512_s20 + $0x18] sm:$0xff] }
 0x20b   : > { %697 = vperm.xlu1 %2271, %v525_v39   ;;  %v733_v39 = vld [vmem:[%s3652_s7 + $0x8] sm:$0xff] }
 0x27d   : > { %v670_v43 = vpop.permute.xlu1 %669 }
 0x27e   : > { %v674_v54 = vmul.f32 %v670_v43, %v660_v49  ;;  %v675_v55 = vmul.f32 %v670_v43, %v661_v50  ;;  %v1069_v43 = vld [vmem:[%s512_s20] sm:$0xff] }
 0x27f   : > { %v665_v46 = vpop.permute.xlu0 %664 }
 0x280   : > { %v672_v47 = vmul.f32 %v665_v46, %v658_v44  ;;  %v673_v48 = vmul.f32 %v665_v46, %v659_v45  ;;  %v2719_v44 = vand.u32 127, %v744_v12  ;;  %v929_v46 = vsub.s32 7, %v2630_v13 }
 0x282   : > { %v693_v51 = vpop.permute.xlu1 %692  ;;  %v686_v52 = vmul.f32 %v679_v42, %v672_v47  ;;  %v687_v53 = vmul.f32 %v679_v42, %v673_v48  ;;  %v1070_v42 = vld [vmem:[%s512_s20 + $0x8] sm:$0xff]  ;;  %vm922_vm2 = vcmp.lt.s32.totalorder %v2719_v44, 112  ;;  %v2724_v49 = vrot.slane %v2636_v15, %v929_v46  ;;  %s3711_s20 = smov 15  }
 0x283   : > { %v2727_v50 = vrot.slane %v2641_v17, %v929_v46  ;;  %vm895_vm3 = vcmp.lt.s32.totalorder %v2719_v44, 113  ;;  %vm868_vm4 = vcmp.lt.s32.totalorder %v2719_v44, 127  ;;  %vm827_vm5 = vcmp.lt.s32.totalorder %v2719_v44, 1 }
 0x284   : > { %v700_v56 = vadd.f32 %v693_v51, %v686_v52  ;;  %v701_v57 = vadd.f32 %v693_v51, %v687_v53  ;;  %v684_v58 = vpop.permute.xlu0 %683  ;;  %vm800_vm6 = vcmp.lt.s32.totalorder %v2719_v44, 15  ;;  %vm773_vm7 = vcmp.lt.s32.totalorder %v2719_v44, 16 }
 0x285   : > { %v688_v59 = vmul.f32 %v684_v58, %v674_v54  ;;  %v689_v60 = vmul.f32 %v684_v58, %v675_v55  ;;  %vm746_vm8 = vcmp.lt.s32.totalorder %v2719_v44, 17  ;;  %vm949_vm9 = vcmp.lt.s32.totalorder %v2719_v44, 111 }
 0x286   : > { %v2140_v61 = vmul.f32 -1.442695, %v700_v56  ;;  %v2141_v62 = vmul.f32 -1.442695, %v701_v57  ;;  %v698_v63 = vpop.permute.xlu1 %697 }
 0x287   : > { %v702_v2 = vadd.f32 %v698_v63, %v688_v59  ;;  %v703_v3 = vadd.f32 %v698_v63, %v689_v60 }
 0x288   : > { %2296 = vpow2.f32 %v2140_v61 }
 0x289   : > { %2298 = vpow2.f32 %v2141_v62  ;;  %v2142_v0 = vmul.f32 -1.442695, %v702_v2  ;;  %v2143_v4 = vmul.f32 -1.442695, %v703_v3 }
 0x28b   : > { %2300 = vpow2.f32 %v2142_v0 }
 0x28c   : > { %2302 = vpow2.f32 %v2143_v4 }
 0x295   : > { %v2297_v1 = vpop.eup %2296 }
 0x296   : > { %v2299_v5 = vpop.eup %2298  ;;  %v716_v6 = vadd.f32 1.0, %v2297_v1 }
 0x297   : > { %v717_v7 = vadd.f32 1.0, %v2299_v5 }
 0x298   : > { %v2301_v8 = vpop.eup %2300  ;;  %2304 = vrcp.f32 %v716_v6 }
 0x299   : > { %v2303_v9 = vpop.eup %2302  ;;  %2306 = vrcp.f32 %v717_v7  ;;  %v718_v10 = vadd.f32 1.0, %v2301_v8 }
 0x29a   : > { %v719_v11 = vadd.f32 1.0, %v2303_v9 }
 0x29b   : > { %2308 = vrcp.f32 %v718_v10  ;;  %v875_v10 = vsub.s32 5, %v2630_v13 }
 0x29c   : > { %2310 = vrcp.f32 %v719_v11 }
 0x2a5   : > { %v2305_v16 = vpop.eup %2304 }
 0x2a6   : > { %v2307_v18 = vpop.eup %2306  ;;  %v728_v19 = vmul.f32 %v2305_v16, %v700_v56 }
 0x2a7   : > { %v729_v23 = vmul.f32 %v2307_v18, %v701_v57  ;;  %v902_v57 = vsub.s32 6, %v2630_v13 }
 0x2a8   : > { %v2309_v22 = vpop.eup %2308  ;;  %914 = vrot.lane.b32.xlu0 %v728_v19, %s3668_s16  ;;  %v2652_v29 = vmul.f32 %v2644_v21, %v728_v19 }
 0x2a9   : > { %v2311_v25 = vpop.eup %2310  ;;  %v730_v26 = vmul.f32 %v2309_v22, %v702_v2  ;;  %v2659_v31 = vmul.f32 %v2648_v24, %v729_v23  ;;  %v2744_v0 = vrot.slane %v2636_v15, %v902_v57  ;;  %v2747_v4 = vrot.slane %v2641_v17, %v902_v57 }
 0x2aa   : > { %v731_v28 = vmul.f32 %v2311_v25, %v703_v3  ;;  %v2764_v25 = vrot.slane %v2636_v15, %v875_v10 }
 0x2ab   : > { %916 = vrot.lane.b32.xlu1 %v730_v26, %s3668_s16  ;;  %v2655_v30 = vmul.f32 %v2644_v21, %v730_v26 }
 0x2ac   : > { %918 = vrot.lane.b32.xlu0 %v729_v23, %s3668_s16  ;;  %v2662_v32 = vmul.f32 %v2648_v24, %v731_v28 }
 0x2ad   : > { %v858_v33 = vpack.c.bf16 %v2655_v30, %v2652_v29 }
 0x2ae   : > { %v859_v34 = vpack.c.bf16 %v2662_v32, %v2659_v31 }
 0x2af   : > { %920 = vrot.lane.b32.xlu1 %v731_v28, %s3668_s16  ;;  %s2183_s16 = sshll.u32 %s2533_s22, 10 }
 0x2b0   : > { %887 = vrot.lane.b32.xlu0 %v728_v19, %s3666_s17  ;;  %s3596_s27 = scalar_lea.hbm %s3660_s15, %s2183_s16 }
 0x2b3   : > { %889 = vrot.lane.b32.xlu1 %v730_v26, %s3666_s17 }
 0x2b4   : > { %891 = vrot.lane.b32.xlu0 %v729_v23, %s3666_s17 }
 0x2b7   : > { %893 = vrot.lane.b32.xlu1 %v731_v28, %s3666_s17  ;;  %s2429_s17 = smov 111  }
 0x2b8   : > { %860 = vrot.lane.b32.xlu0 %v728_v19, %s3664_s0 }
 0x2bb   : > { %862 = vrot.lane.b32.xlu1 %v730_v26, %s3664_s0 }
 0x2bc   : > { %864 = vrot.lane.b32.xlu0 %v729_v23, %s3664_s0 }
 0x2bf   : > { %866 = vrot.lane.b32.xlu1 %v731_v28, %s3664_s0  ;;  %s3674_s0 = smov 17  }
 0x2c0   : > { %819 = vrot.lane.b32.xlu0 %v728_v19, %s3706_s5 }
 0x2c3   : > { %821 = vrot.lane.b32.xlu1 %v730_v26, %s3706_s5 }
 0x2c4   : > { %823 = vrot.lane.b32.xlu0 %v729_v23, %s3706_s5 }
 0x2c7   : > { %825 = vrot.lane.b32.xlu1 %v731_v28, %s3706_s5 }
 0x2c8   : > { %792 = vrot.lane.b32.xlu0 %v728_v19, %s3670_s26 }
 0x2cb   : > { %794 = vrot.lane.b32.xlu1 %v730_v26, %s3670_s26 }
 0x2cc   : > { %796 = vrot.lane.b32.xlu0 %v729_v23, %s3670_s26 }
 0x2cf   : > { %798 = vrot.lane.b32.xlu1 %v731_v28, %s3670_s26 }
 0x2d0   : > { %765 = vrot.lane.b32.xlu0 %v728_v19, %s3672_s23 }
 0x2d3   : > { %767 = vrot.lane.b32.xlu1 %v730_v26, %s3672_s23 }
 0x2d4   : > { %769 = vrot.lane.b32.xlu0 %v729_v23, %s3672_s23 }
 0x2d7   : > { %771 = vrot.lane.b32.xlu1 %v731_v28, %s3672_s23  ;;  %s3717_s23 = smov 127  }
 0x2d8   : > { %736 = vrot.lane.b32.xlu0 %v728_v19, %s3674_s0 }
 0x2db   : > { %738 = vrot.lane.b32.xlu1 %v730_v26, %s3674_s0 }
 0x2dc   : > { %740 = vrot.lane.b32.xlu0 %v729_v23, %s3674_s0 }
 0x2df   : > { %742 = vrot.lane.b32.xlu1 %v731_v28, %s3674_s0  ;;  %s3716_s0 = smov 113  }
 0x2e0   : > { %941 = vrot.lane.b32.xlu0 %v728_v19, %s2429_s17 }
 0x2e3   : > { %943 = vrot.lane.b32.xlu1 %v730_v26, %s2429_s17  ;;  %v2767_v26 = vrot.slane %v2641_v17, %v875_v10 }
 0x2e4   : > { %945 = vrot.lane.b32.xlu0 %v729_v23, %s2429_s17 }
 0x2e7   : > { %947 = vrot.lane.b32.xlu1 %v731_v28, %s2429_s17 }
 0x2e8   : > { %989 = vperm.xlu0 %2270, %v735_v36  }
 0x2eb   : > { %984 = vperm.xlu1 %2271, %v734_v37  }
 0x2ec   : > { %1090 = vperm.xlu0 %2270, %v1072_v38  }
 0x2ef   : > { %979 = vperm.xlu1 %2271, %v733_v39  }
 0x2f0   : > { %1085 = vperm.xlu0 %2270, %v1071_v40   ;;  %v834_v40 = vsub.s32 3, %v2630_v13 }
 0x2f3   : > { %974 = vperm.xlu1 %2271, %v732_v41  }
 0x2f4   : > { %1080 = vperm.xlu0 %2270, %v1070_v42  }
 0x2f7   : > { %1075 = vperm.xlu1 %2271, %v1069_v43  }
 0x31a   : > { %v915_v45 = vpop.permute.xlu0 %914 }
 0x31d   : > { %v917_v47 = vpop.permute.xlu1 %916 }
 0x31e   : > { %v919_v48 = vpop.permute.xlu0 %918 }
 0x31f   : > { %v923_v51 = vsel %vm922_vm2, %v915_v45, %v919_v48  ;;  %v925_v52 = vsel %vm922_vm2, %v919_v48, %v915_v45 }
 0x320   : > { %v935_v58 = vmul.f32 %v2724_v49, %v923_v51  ;;  %v936_v59 = vmul.f32 %v2727_v50, %v925_v52  ;;  %v2784_v52 = vrot.slane %v2636_v15, %v834_v40 }
 0x321   : > { %v921_v53 = vpop.permute.xlu1 %920 }
 0x322   : > { %v924_v54 = vsel %vm922_vm2, %v917_v47, %v921_v53  ;;  %v926_v55 = vsel %vm922_vm2, %v921_v53, %v917_v47  ;;  %v888_v56 = vpop.permute.xlu0 %887  ;;  %v2787_v53 = vrot.slane %v2641_v17, %v834_v40 }
 0x323   : > { %v937_v60 = vmul.f32 %v2724_v49, %v924_v54  ;;  %v938_v61 = vmul.f32 %v2727_v50, %v926_v55 }
 0x325   : > { %v939_v62 = vpack.c.bf16 %v937_v60, %v935_v58  ;;  %v890_v63 = vpop.permute.xlu1 %889  ;;  %v940_v2 = vpack.c.bf16 %v938_v61, %v936_v59  ;;  %v807_v60 = vsub.s32 2, %v2630_v13 }
 0x326   : > { %v892_v3 = vpop.permute.xlu0 %891 }
 0x327   : > { %1016 = vmatprep.subr.bf16.mxu1 %v940_v2  ;;  %v896_v1 = vsel %vm895_vm3, %v888_v56, %v892_v3  ;;  %v898_v5 = vsel %vm895_vm3, %v892_v3, %v888_v56 }
 0x328   : > { %1017 = vmatpush1.bf16.msra.mxu1 %v939_v62  ;;  %v908_v11 = vmul.f32 %v2744_v0, %v896_v1  ;;  %v909_v12 = vmul.f32 %v2747_v4, %v898_v5  ;;  %v2810_v1 = vrot.slane %v2636_v15, %v807_v60  ;;  %v2813_v5 = vrot.slane %v2641_v17, %v807_v60 }
 0x329   : > { %v894_v6 = vpop.permute.xlu1 %893 }
 0x32a   : > { %v897_v7 = vsel %vm895_vm3, %v890_v63, %v894_v6  ;;  %v899_v8 = vsel %vm895_vm3, %v894_v6, %v890_v63  ;;  %v861_v9 = vpop.permute.xlu0 %860 }
 0x32b   : > { %v910_v14 = vmul.f32 %v2744_v0, %v897_v7  ;;  %v911_v16 = vmul.f32 %v2747_v4, %v899_v8 }
 0x32d   : > { %v912_v18 = vpack.c.bf16 %v910_v14, %v908_v11  ;;  %v863_v19 = vpop.permute.xlu1 %862  ;;  %v913_v22 = vpack.c.bf16 %v911_v16, %v909_v12 }
 0x32e   : > { %v865_v23 = vpop.permute.xlu0 %864 }
 0x32f   : > { %1018 = vmatprep.subr.bf16.mxu1 %v913_v22  ;;  %v869_v28 = vsel %vm868_vm4, %v861_v9, %v865_v23  ;;  %v871_v35 = vsel %vm868_vm4, %v865_v23, %v861_v9  ;;  %v780_v9 = vsub.s32 1, %v2630_v13 }
 0x330   : > { %1019 = vmatpush1.bf16.msra.mxu1 %v912_v18  ;;  %v881_v41 = vmul.f32 %v2764_v25, %v869_v28  ;;  %v882_v42 = vmul.f32 %v2767_v26, %v871_v35 }
 0x331   : > { %v867_v36 = vpop.permute.xlu1 %866  ;;  %v2830_v23 = vrot.slane %v2636_v15, %v780_v9  ;;  %v2833_v28 = vrot.slane %v2641_v17, %v780_v9 }
 0x332   : > { %v870_v37 = vsel %vm868_vm4, %v863_v19, %v867_v36  ;;  %v872_v38 = vsel %vm868_vm4, %v867_v36, %v863_v19  ;;  %v820_v39 = vpop.permute.xlu0 %819 }
 0x333   : > { %v883_v43 = vmul.f32 %v2764_v25, %v870_v37  ;;  %v884_v45 = vmul.f32 %v2767_v26, %v872_v38 }
 0x335   : > { %v885_v46 = vpack.c.bf16 %v883_v43, %v881_v41  ;;  %v822_v47 = vpop.permute.xlu1 %821  ;;  %v886_v48 = vpack.c.bf16 %v884_v45, %v882_v42  ;;  %v753_v41 = vsub.s32 0, %v2630_v13 }
 0x336   : > { %v824_v51 = vpop.permute.xlu0 %823 }
 0x337   : > { %1020 = vmatprep.subr.bf16.mxu1 %v886_v48  ;;  %v828_v54 = vsel %vm827_vm5, %v820_v39, %v824_v51  ;;  %v830_v55 = vsel %vm827_vm5, %v824_v51, %v820_v39 }
 0x338   : > { %1021 = vmatpush1.bf16.msra.mxu1 %v885_v46  ;;  %v840_v61 = vmul.f32 %v2784_v52, %v830_v55  ;;  %v841_v62 = vmul.f32 %v2787_v53, %v828_v54  ;;  %v2850_v55 = vrot.slane %v2636_v15, %v753_v41 }
 0x339   : > { %v826_v56 = vpop.permute.xlu1 %825  ;;  %1022 = vmatprep.subr.bf16.mxu1 %v859_v34 }
 0x33a   : > { %v829_v57 = vsel %vm827_vm5, %v822_v47, %v826_v56  ;;  %v831_v58 = vsel %vm827_vm5, %v826_v56, %v822_v47  ;;  %v793_v59 = vpop.permute.xlu0 %792  ;;  %v2853_v56 = vrot.slane %v2641_v17, %v753_v41 }
 0x33b   : > { %v842_v63 = vmul.f32 %v2784_v52, %v831_v58  ;;  %v843_v2 = vmul.f32 %v2787_v53, %v829_v57 }
 0x33c   : > { %1023 = vmatpush1.bf16.msra.mxu1 %v858_v33 }
 0x33d   : > { %v844_v31 = vpack.c.bf16 %v842_v63, %v840_v61  ;;  %v795_v32 = vpop.permute.xlu1 %794  ;;  %v845_v34 = vpack.c.bf16 %v843_v2, %v841_v62 }
 0x33e   : > { %v797_v3 = vpop.permute.xlu0 %796 }
 0x33f   : > { %1024 = vmatprep.subr.bf16.mxu1 %v845_v34  ;;  %v801_v6 = vsel %vm800_vm6, %v793_v59, %v797_v3  ;;  %v803_v29 = vsel %vm800_vm6, %v797_v3, %v793_v59  ;;  %v2871_v3 = vld [vmem:[%s3647_s2 + $0x10] ss:$0 sm:$0xff] }
 0x340   : > { %1025 = vmatpush1.bf16.msra.mxu1 %v844_v31  ;;  %v813_v10 = vmul.f32 %v2810_v1, %v803_v29  ;;  %v814_v11 = vmul.f32 %v2813_v5, %v801_v6  ;;  %v2876_v6 = vld [vmem:[%s3647_s2 + $0x18] ss:$0 sm:$0xff] }
 0x341   : > { %v799_v30 = vpop.permute.xlu1 %798 }
 0x342   : > { %v802_v33 = vsel %vm800_vm6, %v795_v32, %v799_v30  ;;  %v804_v7 = vsel %vm800_vm6, %v799_v30, %v795_v32  ;;  %v766_v8 = vpop.permute.xlu0 %765 }
 0x343   : > { %v815_v12 = vmul.f32 %v2810_v1, %v804_v7  ;;  %v816_v14 = vmul.f32 %v2813_v5, %v802_v33 }
 0x345   : > { %v817_v16 = vpack.c.bf16 %v815_v12, %v813_v10  ;;  %v768_v18 = vpop.permute.xlu1 %767  ;;  %v818_v19 = vpack.c.bf16 %v816_v14, %v814_v11 }
 0x346   : > { %v770_v22 = vpop.permute.xlu0 %769 }
 0x347   : > { %1026 = vmatprep.subr.bf16.mxu1 %v818_v19  ;;  %v774_v35 = vsel %vm773_vm7, %v766_v8, %v770_v22  ;;  %v776_v36 = vsel %vm773_vm7, %v770_v22, %v766_v8  ;;  %v2279_v19 = vld [vmem:[%s3651_s6 + $0x14] ss:$8 sps:$4 sm:$0xff]   ;;  %v2281_v22 = vld [vmem:[%s3651_s6 + $0x10] ss:$8 sps:$4 sm:$0xff]  }
 0x348   : > { %1027 = vmatpush1.bf16.msra.mxu1 %v817_v16  ;;  %v786_v42 = vmul.f32 %v2830_v23, %v776_v36  ;;  %v787_v43 = vmul.f32 %v2833_v28, %v774_v35 }
 0x349   : > { %v772_v37 = vpop.permute.xlu1 %771 }
 0x34a   : > { %v775_v38 = vsel %vm773_vm7, %v768_v18, %v772_v37  ;;  %v777_v39 = vsel %vm773_vm7, %v772_v37, %v768_v18  ;;  %v737_v40 = vpop.permute.xlu0 %736  ;;  %v2278_v18 = vld [vmem:[%s3651_s6] ss:$8 sps:$4 sm:$0xff]  }
 0x34b   : > { %v788_v45 = vmul.f32 %v2830_v23, %v777_v39  ;;  %v789_v46 = vmul.f32 %v2833_v28, %v775_v38 }
 0x34d   : > { %v790_v47 = vpack.c.bf16 %v788_v45, %v786_v42  ;;  %v739_v48 = vpop.permute.xlu1 %738  ;;  %v791_v51 = vpack.c.bf16 %v789_v46, %v787_v43 }
 0x34e   : > { %v741_v54 = vpop.permute.xlu0 %740 }
 0x34f   : > { %1028 = vmatprep.subr.bf16.mxu1 %v791_v51  ;;  %v747_v13 = vsel %vm746_vm8, %v737_v40, %v741_v54  ;;  %v749_v57 = vsel %vm746_vm8, %v741_v54, %v737_v40 }
 0x350   : > { %1029 = vmatpush1.bf16.msra.mxu1 %v790_v47  ;;  %v759_v61 = vmul.f32 %v2850_v55, %v749_v57  ;;  %v760_v17 = vmul.f32 %v2853_v56, %v747_v13 }
 0x351   : > { %v743_v58 = vpop.permute.xlu1 %742 }
 0x352   : > { %v748_v59 = vsel %vm746_vm8, %v739_v48, %v743_v58  ;;  %v750_v60 = vsel %vm746_vm8, %v743_v58, %v739_v48  ;;  %v942_v15 = vpop.permute.xlu0 %941 }
 0x353   : > { %v761_v62 = vmul.f32 %v2850_v55, %v750_v60  ;;  %v762_v63 = vmul.f32 %v2853_v56, %v748_v59 }
 0x355   : > { %v763_v2 = vpack.c.bf16 %v761_v62, %v759_v61  ;;  %v944_v31 = vpop.permute.xlu1 %943  ;;  %v764_v32 = vpack.c.bf16 %v762_v63, %v760_v17 }
 0x356   : > { %v946_v34 = vpop.permute.xlu0 %945 }
 0x357   : > { %1030 = vmatprep.subr.bf16.mxu1 %v764_v32  ;;  %v950_v29 = vsel %vm949_vm9, %v942_v15, %v946_v34  ;;  %v952_v30 = vsel %vm949_vm9, %v946_v34, %v942_v15 }
 0x358   : > { %1031 = vmatpush1.bf16.msra.mxu1 %v763_v2  ;;  %v962_v9 = vmul.f32 %v2871_v3, %v950_v29  ;;  %v963_v10 = vmul.f32 %v2876_v6, %v952_v30 }
 0x359   : > { %v948_v33 = vpop.permute.xlu1 %947 }
 0x35a   : > { %v951_v7 = vsel %vm949_vm9, %v944_v31, %v948_v33  ;;  %v953_v8 = vsel %vm949_vm9, %v948_v33, %v944_v31 }
 0x35b   : > { %v964_v11 = vmul.f32 %v2871_v3, %v951_v7  ;;  %v965_v12 = vmul.f32 %v2876_v6, %v953_v8 }
 0x35d   : > { %v966_v14 = vpack.c.bf16 %v964_v11, %v962_v9  ;;  %v967_v16 = vpack.c.bf16 %v965_v12, %v963_v10 }
 0x35f   : > { %1046 = vmatprep.subr.bf16.mxu1 %v967_v16 }
 0x360   : > { %1047 = vmatpush2.bf16.msra.mxu1 %v966_v14 }
 0x363   : > { %1049 = vmatmul.mubr.bf16.vlgmr.msra.gmra.mxu1 %v2278_v18  ;;  %v990_v35 = vpop.permute.xlu0 %989 }
 0x364   : > { %2151 = vmatprep.mubr.msk.bf16.mxu1 %vm547_vm0, %v2279_v19 }
 0x366   : > { %v985_v37 = vpop.permute.xlu1 %984 }
 0x367   : > { %v1091_v39 = vpop.permute.xlu0 %1090 }
 0x36a   : > { %v980_v42 = vpop.permute.xlu1 %979 }
 0x36b   : > { %1059 = vmatmul.mubr.bf16.gmra.mxu1 %v2281_v22  ;;  %v1086_v46 = vpop.permute.xlu0 %1085 }
 0x36c   : > { %1905 = vmatprep.mubr.bf16.mxu1 %v3680_v20 }
 0x36e   : > { %v975_v59 = vpop.permute.xlu1 %974 }
 0x36f   : > { %v1081_v2 = vpop.permute.xlu0 %1080 }
 0x372   : > { %v1076_v10 = vpop.permute.xlu1 %1075 }
 0x423   : > { %v1050_v36 = vpop.f32.mrf.mxu1 }
 0x424   : > { %v1051_v30 = vadd.f32 %v1050_v36, %v975_v59 }
 0x425   : > { %v1052_v38 = vpop.f32.mrf.mxu1 }
 0x426   : > { %v1053_v31 = vadd.f32 %v1052_v38, %v975_v59  ;;  %v2927_v16 = vadd.f32 %v1076_v10, %v1051_v30 }
 0x427   : > { %v1054_v40 = vpop.f32.mrf.mxu1 }
 0x428   : > { %v1055_v60 = vadd.f32 %v1054_v40, %v980_v42  ;;  %v2923_v11 = vadd.f32 %v1076_v10, %v1053_v31  ;;  %v1109_v40 = vld [vmem:[%s3655_s10] sm:$0xff] }
 0x429   : > { %v1056_v41 = vpop.f32.mrf.mxu1  ;;  %2211 = vmatprep.mubr.msk.f32.mxu0 %vm1149_vm10, %v1109_v40 }
 0x42a   : > { %v1057_v54 = vadd.f32 %v1056_v41, %v980_v42  ;;  %v2917_v33 = vadd.f32 %v1081_v2, %v1055_v60 }
 0x42b   : > { %v1060_v43 = vpop.f32.mrf.mxu1 }
 0x42c   : > { %v1061_v45 = vadd.f32 %v1060_v43, %v985_v37  ;;  %v2911_v32 = vadd.f32 %v1081_v2, %v1057_v54  ;;  %v1127_v19 = vmul.f32 %v2917_v33, %v2917_v33 }
 0x42d   : > { %v1062_v47 = vpop.f32.mrf.mxu1 }
 0x42e   : > { %v1063_v48 = vadd.f32 %v1062_v47, %v985_v37  ;;  %v2901_v13 = vadd.f32 %v1086_v46, %v1061_v45  ;;  %v1128_v14 = vmul.f32 %v2911_v32, %v2911_v32  ;;  %v1116_v36 = vadd.f32 %v2911_v32, %v2917_v33 }
 0x42f   : > { %v1064_v51 = vpop.f32.mrf.mxu1  ;;  %v1125_v37 = vmul.f32 %v2927_v16, %v2927_v16 }
 0x430   : > { %v2903_v57 = vadd.f32 %v1086_v46, %v1063_v48  ;;  %v1065_v58 = vadd.f32 %v1064_v51, %v990_v35  ;;  %v1129_v29 = vmul.f32 %v2901_v13, %v2901_v13  ;;  %v1136_v22 = vadd.f32 %v1128_v14, %v1127_v19  ;;  %v1108_v19 = vld [vmem:[%s3654_s9 + $0x18] sm:$0xff] }
 0x431   : > { %v1066_v15 = vpop.f32.mrf.mxu1 }
 0x432   : > { %v2905_v61 = vadd.f32 %v1091_v39, %v1065_v58  ;;  %v1067_v17 = vadd.f32 %v1066_v15, %v990_v35  ;;  %v1119_v62 = vadd.f32 %v2903_v57, %v2901_v13  ;;  %v1130_v63 = vmul.f32 %v2903_v57, %v2903_v57  ;;  %v1110_v15 = vld [vmem:[%s3655_s10 + $0x8] sm:$0xff] }
 0x433   : > { %v1126_v35 = vmul.f32 %v2923_v11, %v2923_v11 }
 0x434   : > { %v2913_v34 = vadd.f32 %v1091_v39, %v1067_v17  ;;  %1120 = vadd.xlane.f32.xlu0 %v1119_v62  ;;  %v1139_v7 = vadd.f32 %v1130_v63, %v1129_v29  ;;  %v1131_v8 = vmul.f32 %v2905_v61, %v2905_v61  ;;  %v1113_v39 = vadd.f32 %v2923_v11, %v2927_v16  ;;  %v1111_v17 = vld [vmem:[%s3655_s10 + $0x10] sm:$0xff]  ;;  %v1112_v62 = vld [vmem:[%s3655_s10 + $0x18] sm:$0xff] }
 0x435   : > { %v1133_v38 = vadd.f32 %v1126_v35, %v1125_v37  ;;  %v1104_v35 = vld [vmem:[%s3653_s8 + $0x18] sm:$0xff]  ;;  %v1101_v37 = vld [vmem:[%s3653_s8] sm:$0xff] }
 0x436   : > { %v1132_v9 = vmul.f32 %v2913_v34, %v2913_v34  ;;  %v1122_v18 = vadd.f32 %v2913_v34, %v2905_v61 }
 0x438   : > { %1140 = vadd.xlane.f32.xlu0 %v1139_v7  ;;  %v1142_v12 = vadd.f32 %v1132_v9, %v1131_v8 }
 0x43a   : > { %1143 = vadd.xlane.f32.xlu1 %v1142_v12 }
 0x43c   : > { %1123 = vadd.xlane.f32.xlu0 %v1122_v18 }
 0x43e   : > { %1137 = vadd.xlane.f32.xlu1 %v1136_v22  ;;  %v1103_v22 = vld [vmem:[%s3653_s8 + $0x10] sm:$0xff] }
 0x440   : > { %1117 = vadd.xlane.f32.xlu0 %v1116_v36  ;;  %v1107_v36 = vld [vmem:[%s3654_s9 + $0x10] sm:$0xff] }
 0x442   : > { %1134 = vadd.xlane.f32.xlu1 %v1133_v38 }
 0x444   : > { %1114 = vadd.xlane.f32.xlu0 %v1113_v39 }
 0x4bd   : > { %v1121_v41 = vpop.xlane.xlu0 %1120 }
 0x4c1   : > { %v1141_v42 = vpop.xlane.xlu0 %1140 }
 0x4c2   : > { %v1147_v48 = vsel %vm544_vm1, %v1121_v41, %v1141_v42 }
 0x4c3   : > { %v1144_v43 = vpop.xlane.xlu1 %1143 }
 0x4c5   : > { %v1124_v45 = vpop.xlane.xlu0 %1123 }
 0x4c6   : > { %v1148_v46 = vsel %vm544_vm1, %v1124_v45, %v1144_v43 }
 0x4c7   : > { %v1138_v47 = vpop.xlane.xlu1 %1137  ;;  %2203 = vmatprep.subr.mxu0 %v1148_v46 }
 0x4c8   : > { %2204 = vmatpush3.msra.mxu0 %v1148_v46 }
 0x4c9   : > { %2205 = vmatprep.subr.mxu0 %v1147_v48  ;;  %v1118_v51 = vpop.xlane.xlu0 %1117 }
 0x4ca   : > { %2206 = vmatpush3.msra.mxu0 %v1147_v48  ;;  %v1146_v54 = vsel %vm544_vm1, %v1118_v51, %v1138_v47 }
 0x4cb   : > { %2207 = vmatprep.subr.mxu0 %v1146_v54  ;;  %v1135_v58 = vpop.xlane.xlu1 %1134 }
 0x4cc   : > { %2208 = vmatpush3.msra.mxu0 %v1146_v54 }
 0x4cd   : > { %v1115_v59 = vpop.xlane.xlu0 %1114 }
 0x4ce   : > { %v1145_v60 = vsel %vm544_vm1, %v1115_v59, %v1135_v58 }
 0x4cf   : > { %2209 = vmatprep.subr.mxu0 %v1145_v60 }
 0x4d0   : > { %2210 = vmatpush3.msra.mxu0 %v1145_v60  ;;  %v1105_v60 = vld [vmem:[%s3654_s9] sm:$0xff] }
 0x4d1   : > { %2212 = vmatmul.mubr.msk.f32.vlgmr.msra.gmra.mxu0 %vm1149_vm10, %v1110_v15 }
 0x4d2   : > { %2214 = vmatprep.mubr.msk.f32.mxu0 %vm1149_vm10, %v1111_v17  ;;  %v1102_v17 = vld [vmem:[%s3653_s8 + $0x8] sm:$0xff] }
 0x4d5   : > { %2215 = vmatmul.mubr.msk.f32.gmra.mxu0 %vm1149_vm10, %v1112_v62  ;;  %v1106_v62 = vld [vmem:[%s3654_s9 + $0x8] sm:$0xff] }
 0x591   : > { %v2213_v63 = vpop.f32.mrf.mxu0 }
 0x592   : > { %v1249_v12 = vmul.f32 0.0009765625, %v2213_v63 }
 0x593   : > { %v1228_v2 = vpop.f32.mrf.mxu0 }
 0x594   : > { %v1248_v7 = vmul.f32 0.0009765625, %v1228_v2  ;;  %v1253_v18 = vmul.f32 %v1249_v12, %v1249_v12 }
 0x595   : > { %v2216_v31 = vpop.f32.mrf.mxu0 }
 0x596   : > { %v1251_v29 = vmul.f32 0.0009765625, %v2216_v31  ;;  %v1252_v14 = vmul.f32 %v1248_v7, %v1248_v7 }
 0x597   : > { %v1238_v30 = vpop.f32.mrf.mxu0 }
 0x598   : > { %v1250_v8 = vmul.f32 0.0009765625, %v1238_v30  ;;  %v1255_v9 = vmul.f32 %v1251_v29, %v1251_v29 }
 0x59a   : > { %1266 = vrot.lane.b32.xlu1 %v1255_v9, %s3706_s5  ;;  %v1254_v10 = vmul.f32 %v1250_v8, %v1250_v8 }
 0x59c   : > { %1264 = vrot.lane.b32.xlu0 %v1254_v10, %s3706_s5 }
 0x59e   : > { %1260 = vrot.lane.b32.xlu1 %v1252_v14, %s3706_s5 }
 0x5a0   : > { %1296 = vperm.xlu0 %2270, %v1250_v8  }
 0x5a2   : > { %1262 = vrot.lane.b32.xlu1 %v1253_v18, %s3706_s5 }
 0x5a4   : > { %1291 = vperm.xlu0 %2270, %v1249_v12  }
 0x5a6   : > { %1301 = vperm.xlu1 %2271, %v1251_v29  }
 0x5a8   : > { %1385 = vperm.xlu0 %2270, %v1108_v19  }
 0x5aa   : > { %1286 = vperm.xlu1 %2271, %v1248_v7  }
 0x5ac   : > { %2273 = vset.pattern.permute.xlu0 %v2422_v27 }
 0x5ae   : > { %1352 = vperm.xlu1 %2271, %v1103_v22  }
 0x5b2   : > { %1357 = vperm.xlu1 %2271, %v1104_v35  }
 0x5b6   : > { %1380 = vperm.xlu1 %2271, %v1107_v36  }
 0x5ba   : > { %1342 = vperm.xlu1 %2271, %v1101_v37  }
 0x5be   : > { %2272 = vset.pattern.permute.xlu1 %v2422_v27 }
 0x60c   : > { %v1267_v38 = vpop.permute.xlu1 %1266 }
 0x60d   : > { %v1275_v47 = vsub.f32 %v1251_v29, %v1267_v38 }
 0x60e   : > { %v1265_v39 = vpop.permute.xlu0 %1264 }
 0x60f   : > { %v1274_v40 = vsub.f32 %v1250_v8, %v1265_v39  ;;  %v1279_v54 = vadd.f32 1e-05, %v1275_v47 }
 0x610   : > { %v1261_v41 = vpop.permute.xlu1 %1260 }
 0x611   : > { %v1272_v42 = vsub.f32 %v1248_v7, %v1261_v41  ;;  %v1278_v45 = vadd.f32 1e-05, %v1274_v40 }
 0x613   : > { %v1276_v43 = vadd.f32 1e-05, %v1272_v42 }
 0x614   : > { %v1263_v46 = vpop.permute.xlu1 %1262 }
 0x615   : > { %2312 = vrsqrt.f32 %v1276_v43  ;;  %v1273_v48 = vsub.f32 %v1249_v12, %v1263_v46 }
 0x616   : > { %2314 = vrsqrt.f32 %v1278_v45 }
 0x617   : > { %v1277_v51 = vadd.f32 1e-05, %v1273_v48 }
 0x619   : > { %2316 = vrsqrt.f32 %v1277_v51 }
 0x61a   : > { %2318 = vrsqrt.f32 %v1279_v54 }
 0x61b   : > { %v2995_v29 = vpop.permute.xlu0 %1296 }
 0x61c   : > { %v1309_v19 = vsub.f32 %v2903_v57, %v2995_v29 }
 0x61f   : > { %v1292_v7 = vpop.permute.xlu0 %1291 }
 0x620   : > { %v1306_v51 = vsub.f32 %v2917_v33, %v1292_v7  ;;  %v1307_v54 = vsub.f32 %v2911_v32, %v1292_v7 }
 0x621   : > { %v1302_v63 = vpop.permute.xlu1 %1301 }
 0x622   : > { %v2313_v58 = vpop.eup %2312  ;;  %v1310_v39 = vsub.f32 %v2905_v61, %v1302_v63  ;;  %v1311_v40 = vsub.f32 %v2913_v34, %v1302_v63 }
 0x623   : > { %1314 = vperm.xlu0 %2273, %v2313_v58   ;;  %v2315_v59 = vpop.eup %2314  ;;  %v1386_v9 = vpop.permute.xlu0 %1385 }
 0x625   : > { %v1287_v2 = vpop.permute.xlu1 %1286 }
 0x626   : > { %v2317_v27 = vpop.eup %2316  ;;  %v1304_v14 = vsub.f32 %v2927_v16, %v1287_v2  ;;  %v1305_v18 = vsub.f32 %v2923_v11, %v1287_v2 }
 0x627   : > { %1319 = vperm.xlu1 %2272, %v2317_v27   ;;  %1324 = vperm.xlu0 %2273, %v2315_v59   ;;  %v2319_v15 = vpop.eup %2318 }
 0x629   : > { %v2993_v31 = vpop.permute.xlu1 %1352 }
 0x62b   : > { %1329 = vperm.xlu1 %2272, %v2319_v15   ;;  %2275 = vset.pattern.permute.xlu0 %v3680_v20 }
 0x62c   : > { %1370 = vperm.xlu0 %2275, %v1105_v60  }
 0x62d   : > { %v1358_v30 = vpop.permute.xlu1 %1357 }
 0x62f   : > { %2274 = vset.pattern.permute.xlu1 %v3680_v20 }
 0x630   : > { %1347 = vperm.xlu1 %2274, %v1102_v17  }
 0x631   : > { %v2997_v8 = vpop.permute.xlu1 %1380 }
 0x634   : > { %1375 = vperm.xlu1 %2274, %v1106_v62  }
 0x635   : > { %v1343_v10 = vpop.permute.xlu1 %1342 }
 0x69e   : > { %v1315_v12 = vpop.permute.xlu0 %1314 }
 0x69f   : > { %v1332_v22 = vmul.f32 %v1315_v12, %v1304_v14  ;;  %v1333_v35 = vmul.f32 %v1315_v12, %v1305_v18 }
 0x6a1   : > { %v1360_v42 = vmul.f32 %v1343_v10, %v1332_v22  ;;  %v1361_v43 = vmul.f32 %v1343_v10, %v1333_v35 }
 0x6a2   : > { %v1320_v36 = vpop.permute.xlu1 %1319  ;;  %v1325_v37 = vpop.permute.xlu0 %1324 }
 0x6a3   : > { %v3003_v38 = vmul.f32 %v1325_v37, %v1309_v19  ;;  %v1334_v60 = vmul.f32 %v1320_v36, %v1306_v51  ;;  %v1335_v15 = vmul.f32 %v1320_v36, %v1307_v54 }
 0x6a6   : > { %v1330_v41 = vpop.permute.xlu1 %1329 }
 0x6a7   : > { %v1338_v45 = vmul.f32 %v1330_v41, %v1310_v39  ;;  %v1339_v16 = vmul.f32 %v1330_v41, %v1311_v40  ;;  %v1371_v46 = vpop.permute.xlu0 %1370 }
 0x6a8   : > { %v1388_v11 = vadd.f32 %v1371_v46, %v1360_v42  ;;  %v1389_v47 = vadd.f32 %v1371_v46, %v1361_v43  ;;  %v1308_v42 = vsub.f32 %v2901_v13, %v2995_v29 }
 0x6a9   : > { %v1366_v48 = vmul.f32 %v1358_v30, %v1338_v45  ;;  %v1367_v57 = vmul.f32 %v1358_v30, %v1339_v16 }
 0x6aa   : > { %v2156_v58 = vmul.f32 -1.442695, %v1388_v11  ;;  %v2157_v59 = vmul.f32 -1.442695, %v1389_v47  ;;  %v1336_v16 = vmul.f32 %v1325_v37, %v1308_v42 }
 0x6ab   : > { %v3009_v27 = vadd.f32 %v1386_v9, %v1366_v48  ;;  %v3011_v61 = vadd.f32 %v1386_v9, %v1367_v57  ;;  %v1348_v34 = vpop.permute.xlu1 %1347 }
 0x6ac   : > { %2320 = vpow2.f32 %v2156_v58  ;;  %v1362_v17 = vmul.f32 %v1348_v34, %v1334_v60  ;;  %v1363_v62 = vmul.f32 %v1348_v34, %v1335_v15  ;;  %v1364_v37 = vmul.f32 %v2993_v31, %v1336_v16 }
 0x6ad   : > { %2322 = vpow2.f32 %v2157_v59 }
 0x6ae   : > { %v1392_v48 = vadd.f32 %v2997_v8, %v1364_v37 }
 0x6af   : > { %v1376_v63 = vpop.permute.xlu1 %1375 }
 0x6b0   : > { %v1390_v2 = vadd.f32 %v1376_v63, %v1362_v17  ;;  %v1391_v30 = vadd.f32 %v1376_v63, %v1363_v62  ;;  %v2160_v51 = vmul.f32 -1.442695, %v1392_v48 }
 0x6b2   : > { %v2158_v10 = vmul.f32 -1.442695, %v1390_v2  ;;  %v2159_v33 = vmul.f32 -1.442695, %v1391_v30 }
 0x6b4   : > { %2324 = vpow2.f32 %v2158_v10 }
 0x6b5   : > { %2326 = vpow2.f32 %v2159_v33 }
 0x6b9   : > { %v2321_v32 = vpop.eup %2320 }
 0x6ba   : > { %v2323_v7 = vpop.eup %2322  ;;  %v1420_v12 = vadd.f32 1.0, %v2321_v32 }
 0x6bb   : > { %v1421_v14 = vadd.f32 1.0, %v2323_v7 }
 0x6bc   : > { %2328 = vrcp.f32 %v1420_v12 }
 0x6bd   : > { %2330 = vrcp.f32 %v1421_v14 }
 0x6c1   : > { %v2325_v9 = vpop.eup %2324 }
 0x6c2   : > { %v2327_v18 = vpop.eup %2326  ;;  %v1422_v19 = vadd.f32 1.0, %v2325_v9 }
 0x6c3   : > { %v1423_v22 = vadd.f32 1.0, %v2327_v18 }
 0x6c4   : > { %2332 = vrcp.f32 %v1422_v19 }
 0x6c5   : > { %2334 = vrcp.f32 %v1423_v22 }
 0x6c6   : > { %2336 = vpow2.f32 %v2160_v51 }
 0x6c9   : > { %v2329_v35 = vpop.eup %2328 }
 0x6ca   : > { %v3013_v36 = vmul.f32 %v2329_v35, %v1388_v11  ;;  %v2331_v39 = vpop.eup %2330  ;;  %v1452_v35 = vld [vmem:[%s3657_s12] sm:$0xff] }
 0x6cb   : > { %v3017_v40 = vmul.f32 %v2331_v39, %v1389_v47  ;;  %v1365_v47 = vmul.f32 %v2993_v31, %v3003_v38  ;;  %v2162_v31 = vmul.f32 -1.442695, %v3009_v27 }
 0x6cc   : > { %1564 = vrot.lane.b32.xlu0 %v3013_v36, %s3706_s5  ;;  %v3029_v46 = vmul.f32 %v3013_v36, %v2644_v21 }
 0x6cd   : > { %3708 = vst [vmem:[#allocation10_spill] sm:$0xff] %v3017_v40  ;;  %v1393_v57 = vadd.f32 %v2997_v8, %v1365_v47  ;;  %v2163_v8 = vmul.f32 -1.442695, %v3011_v61 }
 0x6ce   : > { %3709 = vst [vmem:[#allocation11_spill] sm:$0xff] %v3029_v46 }
 0x6cf   : > { %v2161_v54 = vmul.f32 -1.442695, %v1393_v57 }
 0x6d0   : > { %1572 = vrot.lane.b32.xlu0 %v3017_v40, %s3706_s5 }
 0x6d1   : > { %v2333_v41 = vpop.eup %2332  ;;  %2338 = vpow2.f32 %v2161_v54 }
 0x6d2   : > { %v3023_v43 = vmul.f32 %v2333_v41, %v1390_v2  ;;  %v2335_v45 = vpop.eup %2334  ;;  %2340 = vpow2.f32 %v2162_v31 }
 0x6d3   : > { %v3037_v13 = vmul.f32 %v2335_v45, %v1391_v30  ;;  %2342 = vpow2.f32 %v2163_v8  ;;  %v2337_v38 = vpop.eup %2336  ;;  %v1453_v8 = vld [vmem:[%s3657_s12 + $0x8] sm:$0xff] }
 0x6d4   : > { %1566 = vrot.lane.b32.xlu1 %v3023_v43, %s3706_s5  ;;  %v3033_v11 = vmul.f32 %v3023_v43, %v2644_v21  ;;  %1528 = vrot.lane.b32.xlu0 %v3013_v36, %s3711_s20  ;;  %v1424_v58 = vadd.f32 1.0, %v2337_v38  ;;  %v2286_v38 = vld [vmem:[%s3656_s11 + $0x4] ss:$12 sps:$4 sm:$0xff]  }
 0x6d5   : > { %3712 = vst [vmem:[#allocation13_spill] sm:$0xff] %v3037_v13  ;;  %1852 = vmatprep.mubr.bf16.mxu0 %v2286_v38 }
 0x6d6   : > { %3710 = vst [vmem:[#allocation12_spill] sm:$0xff] %v3033_v11  ;;  %2344 = vrcp.f32 %v1424_v58 }
 0x6d8   : > { %1574 = vrot.lane.b32.xlu1 %v3037_v13, %s3706_s5  ;;  %1536 = vrot.lane.b32.xlu0 %v3017_v40, %s3711_s20 }
 0x6dc   : > { %1530 = vrot.lane.b32.xlu1 %v3023_v43, %s3711_s20  ;;  %1492 = vrot.lane.b32.xlu0 %v3013_v36, %s3713_s24 }
 0x6de   : > { %v2339_v59 = vpop.eup %2338 }
 0x6df   : > { %v2341_v34 = vpop.eup %2340  ;;  %v1425_v60 = vadd.f32 1.0, %v2339_v59  ;;  %v1932_v59 = vld [vmem:[%s3659_s14] sm:$0xff] }
 0x6e0   : > { %1538 = vrot.lane.b32.xlu1 %v3037_v13, %s3711_s20  ;;  %1500 = vrot.lane.b32.xlu0 %v3017_v40, %s3713_s24  ;;  %v1426_v15 = vadd.f32 1.0, %v2341_v34  ;;  %v2343_v17 = vpop.eup %2342 }
 0x6e1   : > { %2346 = vrcp.f32 %v1425_v60  ;;  %v1427_v62 = vadd.f32 1.0, %v2343_v17 }
 0x6e2   : > { %2348 = vrcp.f32 %v1426_v15 }
 0x6e3   : > { %2350 = vrcp.f32 %v1427_v62  ;;  %v2345_v63 = vpop.eup %2344 }
 0x6e4   : > { %1494 = vrot.lane.b32.xlu1 %v3023_v43, %s3713_s24  ;;  %1456 = vrot.lane.b32.xlu0 %v3013_v36, %s3714_s29  ;;  %v3096_v2 = vmul.f32 %v2345_v63, %v1392_v48 }
 0x6e6   : > { %3718 = vst [vmem:[#allocation14_spill] sm:$0xff] %v3096_v2 }
 0x6e8   : > { %1502 = vrot.lane.b32.xlu1 %v3037_v13, %s3713_s24  ;;  %1464 = vrot.lane.b32.xlu0 %v3017_v40, %s3714_s29 }
 0x6ec   : > { %1458 = vrot.lane.b32.xlu1 %v3023_v43, %s3714_s29  ;;  %1684 = vrot.lane.b32.xlu0 %v3013_v36, %s3715_s30 }
 0x6ee   : > { %v2347_v30 = vpop.eup %2346 }
 0x6ef   : > { %v2349_v10 = vpop.eup %2348  ;;  %v3102_v33 = vmul.f32 %v2347_v30, %v1393_v57  ;;  %v1454_v57 = vld [vmem:[%s3657_s12 + $0x10] sm:$0xff] }
 0x6f0   : > { %1466 = vrot.lane.b32.xlu1 %v3037_v13, %s3714_s29  ;;  %1692 = vrot.lane.b32.xlu0 %v3017_v40, %s3715_s30  ;;  %v3109_v32 = vmul.f32 %v2349_v10, %v3009_v27  ;;  %v2351_v7 = vpop.eup %2350 }
 0x6f1   : > { %3719 = vst [vmem:[#allocation15_spill] sm:$0xff] %v3102_v33  ;;  %v3116_v12 = vmul.f32 %v2351_v7, %v3011_v61  ;;  %v1455_v7 = vld [vmem:[%s3657_s12 + $0x18] sm:$0xff] }
 0x6f2   : > { %3720 = vst [vmem:[#allocation16_spill] sm:$0xff] %v3109_v32 }
 0x6f4   : > { %1686 = vrot.lane.b32.xlu1 %v3023_v43, %s3715_s30  ;;  %1648 = vrot.lane.b32.xlu0 %v3013_v36, %s3716_s0 }
 0x6f8   : > { %1694 = vrot.lane.b32.xlu1 %v3037_v13, %s3715_s30  ;;  %1656 = vrot.lane.b32.xlu0 %v3017_v40, %s3716_s0  ;;  %v3736_v44 = vld [vmem:[#allocation15_spill] sm:$0xff] }
 0x6fc   : > { %1650 = vrot.lane.b32.xlu1 %v3023_v43, %s3716_s0  ;;  %1720 = vrot.lane.b32.xlu0 %v3013_v36, %s2429_s17 }
 0x700   : > { %1658 = vrot.lane.b32.xlu1 %v3037_v13, %s3716_s0  ;;  %1728 = vrot.lane.b32.xlu0 %v3017_v40, %s2429_s17 }
 0x704   : > { %1722 = vrot.lane.b32.xlu1 %v3023_v43, %s2429_s17  ;;  %1612 = vrot.lane.b32.xlu0 %v3013_v36, %s3717_s23 }
 0x708   : > { %1730 = vrot.lane.b32.xlu1 %v3037_v13, %s2429_s17  ;;  %1568 = vrot.lane.b32.xlu0 %v3096_v2, %s3706_s5 }
 0x70c   : > { %1614 = vrot.lane.b32.xlu1 %v3023_v43, %s3717_s23  ;;  %1576 = vrot.lane.b32.xlu0 %v3102_v33, %s3706_s5 }
 0x710   : > { %1570 = vrot.lane.b32.xlu1 %v3109_v32, %s3706_s5  ;;  %1532 = vrot.lane.b32.xlu0 %v3096_v2, %s3711_s20 }
 0x714   : > { %1578 = vrot.lane.b32.xlu1 %v3116_v12, %s3706_s5  ;;  %1540 = vrot.lane.b32.xlu0 %v3102_v33, %s3711_s20 }
 0x718   : > { %1534 = vrot.lane.b32.xlu1 %v3109_v32, %s3711_s20  ;;  %1496 = vrot.lane.b32.xlu0 %v3096_v2, %s3713_s24 }
 0x71c   : > { %1542 = vrot.lane.b32.xlu1 %v3116_v12, %s3711_s20  ;;  %1504 = vrot.lane.b32.xlu0 %v3102_v33, %s3713_s24  ;;  %s2430_s20 = smov [#allocation2]  }
 0x720   : > { %1498 = vrot.lane.b32.xlu1 %v3109_v32, %s3713_s24  ;;  %1460 = vrot.lane.b32.xlu0 %v3096_v2, %s3714_s29 }
 0x724   : > { %1506 = vrot.lane.b32.xlu1 %v3116_v12, %s3713_s24  ;;  %1468 = vrot.lane.b32.xlu0 %v3102_v33, %s3714_s29 }
 0x728   : > { %1462 = vrot.lane.b32.xlu1 %v3109_v32, %s3714_s29  ;;  %1688 = vrot.lane.b32.xlu0 %v3096_v2, %s3715_s30 }
 0x72c   : > { %1470 = vrot.lane.b32.xlu1 %v3116_v12, %s3714_s29  ;;  %1696 = vrot.lane.b32.xlu0 %v3102_v33, %s3715_s30  ;;  %s2362_s29 = sshll.u32 %s2430_s20, 4  ;;  %s2363_s29 = int_to_ptr.vmem [resolvable:$false] %s2362_s29 }
 0x730   : > { %1690 = vrot.lane.b32.xlu1 %v3109_v32, %s3715_s30  ;;  %1652 = vrot.lane.b32.xlu0 %v3096_v2, %s3716_s0 }
 0x734   : > { %1698 = vrot.lane.b32.xlu1 %v3116_v12, %s3715_s30  ;;  %1660 = vrot.lane.b32.xlu0 %v3102_v33, %s3716_s0  ;;  %s2364_s30 = scalar_lea.vmem %s2363_s29, 2048 }
 0x738   : > { %1654 = vrot.lane.b32.xlu1 %v3109_v32, %s3716_s0  ;;  %1724 = vrot.lane.b32.xlu0 %v3096_v2, %s2429_s17 }
 0x73c   : > { %1662 = vrot.lane.b32.xlu1 %v3116_v12, %s3716_s0  ;;  %1732 = vrot.lane.b32.xlu0 %v3102_v33, %s2429_s17 }
 0x73e   : > { %v1565_v27 = vpop.permute.xlu0 %1564 }
 0x740   : > { %1726 = vrot.lane.b32.xlu1 %v3109_v32, %s2429_s17  ;;  %1616 = vrot.lane.b32.xlu0 %v3096_v2, %s3717_s23 }
 0x742   : > { %v1573_v61 = vpop.permute.xlu0 %1572 }
 0x743   : > { %v1584_v14 = vsel %vm827_vm5, %v1573_v61, %v1565_v27  ;;  %v1580_v19 = vsel %vm827_vm5, %v1565_v27, %v1573_v61 }
 0x744   : > { %1734 = vrot.lane.b32.xlu1 %v3116_v12, %s2429_s17  ;;  %1624 = vrot.lane.b32.xlu0 %v3102_v33, %s3717_s23  ;;  %v3182_v36 = vmul.f32 %v1584_v14, %v2784_v52  ;;  %v3189_v43 = vmul.f32 %v1580_v19, %v2787_v53  ;;  %v1934_v14 = vld [vmem:[%s3659_s14 + $0x10] sm:$0xff] }
 0x746   : > { %v1567_v9 = vpop.permute.xlu1 %1566  ;;  %v1529_v18 = vpop.permute.xlu0 %1528 }
 0x748   : > { %1618 = vrot.lane.b32.xlu1 %v3109_v32, %s3717_s23  ;;  %1620 = vrot.lane.b32.xlu0 %v3017_v40, %s3717_s23 }
 0x74a   : > { %v1575_v22 = vpop.permute.xlu1 %1574  ;;  %v1537_v42 = vpop.permute.xlu0 %1536 }
 0x74b   : > { %v1581_v39 = vsel %vm827_vm5, %v1567_v9, %v1575_v22  ;;  %v1585_v41 = vsel %vm827_vm5, %v1575_v22, %v1567_v9  ;;  %v1548_v37 = vsel %vm800_vm6, %v1537_v42, %v1529_v18  ;;  %v1544_v31 = vsel %vm800_vm6, %v1529_v18, %v1537_v42  ;;  %v1933_v22 = vld [vmem:[%s3659_s14 + $0x8] sm:$0xff] }
 0x74c   : > { %v3192_v45 = vmul.f32 %v1585_v41, %v2784_v52  ;;  %v3195_v16 = vmul.f32 %v1581_v39, %v2787_v53  ;;  %1626 = vrot.lane.b32.xlu1 %v3116_v12, %s3717_s23  ;;  %1766 = vperm.xlu0 %2275, %v1452_v35   ;;  %v3222_v34 = vmul.f32 %v1548_v37, %v2810_v1 }
 0x74d   : > { %v3229_v62 = vmul.f32 %v1544_v31, %v2813_v5 }
 0x74e   : > { %v1531_v48 = vpop.permute.xlu1 %1530  ;;  %v1493_v54 = vpop.permute.xlu0 %1492 }
 0x750   : > { %1622 = vrot.lane.b32.xlu1 %v3037_v13, %s3717_s23  ;;  %1776 = vperm.xlu0 %2275, %v1454_v57   ;;  %s500_s23 = sand.u32 1, %s2410_s19  }
 0x751   : > { %s3604_s22 = scalar_lea.sflag [#allocation3], %s500_s23 }
 0x752   : > { %v1539_v58 = vpop.permute.xlu1 %1538  ;;  %v1501_v17 = vpop.permute.xlu0 %1500 }
 0x753   : > { %v1545_v60 = vsel %vm800_vm6, %v1531_v48, %v1539_v58  ;;  %v1549_v15 = vsel %vm800_vm6, %v1539_v58, %v1531_v48  ;;  %v1512_v10 = vsel %vm773_vm7, %v1501_v17, %v1493_v54  ;;  %v1508_v19 = vsel %vm773_vm7, %v1493_v54, %v1501_v17 }
 0x754   : > { %v3232_v63 = vmul.f32 %v1549_v15, %v2810_v1  ;;  %v3235_v30 = vmul.f32 %v1545_v60, %v2813_v5  ;;  %1771 = vperm.xlu1 %2274, %v1453_v8   ;;  %1938 = vperm.xlu0 %2275, %v1932_v59   ;;  %v3255_v39 = vmul.f32 %v1512_v10, %v2830_v23  ;;  %v1935_v8 = vld [vmem:[%s3659_s14 + $0x18] sm:$0xff] }
 0x755   : > { %v3262_v48 = vmul.f32 %v1508_v19, %v2833_v28 }
 0x756   : > { %v1495_v61 = vpop.permute.xlu1 %1494  ;;  %v1457_v18 = vpop.permute.xlu0 %1456 }
 0x758   : > { %1781 = vperm.xlu1 %2274, %v1455_v7   ;;  %1948 = vperm.xlu0 %2275, %v1934_v14  }
 0x75a   : > { %v1503_v35 = vpop.permute.xlu1 %1502  ;;  %v1465_v37 = vpop.permute.xlu0 %1464 }
 0x75b   : > { %v1509_v41 = vsel %vm773_vm7, %v1495_v61, %v1503_v35  ;;  %v1513_v42 = vsel %vm773_vm7, %v1503_v35, %v1495_v61  ;;  %v1476_v31 = vsel %vm746_vm8, %v1465_v37, %v1457_v18  ;;  %v1472_v15 = vsel %vm746_vm8, %v1457_v18, %v1465_v37 }
 0x75c   : > { %v3265_v57 = vmul.f32 %v1513_v42, %v2830_v23  ;;  %v3268_v54 = vmul.f32 %v1509_v41, %v2833_v28  ;;  %1943 = vperm.xlu1 %2274, %v1933_v22   ;;  %v3282_v10 = vmul.f32 %v1476_v31, %v2850_v55  ;;  %v3289_v19 = vmul.f32 %v1472_v15, %v2853_v56 }
 0x75e   : > { %v1459_v58 = vpop.permute.xlu1 %1458  ;;  %v1685_v60 = vpop.permute.xlu0 %1684 }
 0x760   : > { %1953 = vperm.xlu1 %2274, %v1935_v8  }
 0x762   : > { %v1467_v17 = vpop.permute.xlu1 %1466  ;;  %v1693_v14 = vpop.permute.xlu0 %1692 }
 0x763   : > { %v1473_v7 = vsel %vm746_vm8, %v1459_v58, %v1467_v17  ;;  %v1477_v61 = vsel %vm746_vm8, %v1467_v17, %v1459_v58  ;;  %v1700_v18 = vsel %vm922_vm2, %v1685_v60, %v1693_v14  ;;  %v1704_v8 = vsel %vm922_vm2, %v1693_v14, %v1685_v60 }
 0x764   : > { %v3292_v22 = vmul.f32 %v1477_v61, %v2850_v55  ;;  %v3295_v35 = vmul.f32 %v1473_v7, %v2853_v56  ;;  %v3306_v15 = vmul.f32 %v1700_v18, %v2724_v49  ;;  %v3313_v29 = vmul.f32 %v1704_v8, %v2727_v50 }
 0x766   : > { %v1687_v42 = vpop.permute.xlu1 %1686  ;;  %v1649_v31 = vpop.permute.xlu0 %1648 }
 0x76a   : > { %v1695_v58 = vpop.permute.xlu1 %1694  ;;  %v1657_v61 = vpop.permute.xlu0 %1656 }
 0x76b   : > { %v1701_v17 = vsel %vm922_vm2, %v1687_v42, %v1695_v58  ;;  %v1705_v7 = vsel %vm922_vm2, %v1695_v58, %v1687_v42  ;;  %v1664_v60 = vsel %vm895_vm3, %v1649_v31, %v1657_v61  ;;  %v1668_v8 = vsel %vm895_vm3, %v1657_v61, %v1649_v31 }
 0x76c   : > { %v3316_v20 = vmul.f32 %v1701_v17, %v2724_v49  ;;  %v3319_v41 = vmul.f32 %v1705_v7, %v2727_v50  ;;  %v3330_v17 = vmul.f32 %v1664_v60, %v2744_v0  ;;  %v3337_v14 = vmul.f32 %v1668_v8, %v2747_v4 }
 0x76e   : > { %v1651_v18 = vpop.permute.xlu1 %1650  ;;  %v1721_v58 = vpop.permute.xlu0 %1720 }
 0x772   : > { %v1659_v37 = vpop.permute.xlu1 %1658  ;;  %v1729_v59 = vpop.permute.xlu0 %1728 }
 0x773   : > { %v1665_v7 = vsel %vm895_vm3, %v1651_v18, %v1659_v37  ;;  %v1669_v38 = vsel %vm895_vm3, %v1659_v37, %v1651_v18  ;;  %v1736_v31 = vsel %vm949_vm9, %v1721_v58, %v1729_v59  ;;  %v1740_v8 = vsel %vm949_vm9, %v1729_v59, %v1721_v58 }
 0x774   : > { %v3340_v42 = vmul.f32 %v1665_v7, %v2744_v0  ;;  %v3343_v27 = vmul.f32 %v1669_v38, %v2747_v4  ;;  %v3360_v51 = vmul.f32 %v2871_v3, %v1736_v31  ;;  %v3363_v61 = vmul.f32 %v2876_v6, %v1740_v8 }
 0x776   : > { %v1723_v60 = vpop.permute.xlu1 %1722  ;;  %v3351_v18 = vpop.permute.xlu0 %1612 }
 0x77a   : > { %v1731_v7 = vpop.permute.xlu1 %1730  ;;  %v1569_v47 = vpop.permute.xlu0 %1568 }
 0x77b   : > { %v1737_v38 = vsel %vm949_vm9, %v1723_v60, %v1731_v7  ;;  %v1741_v9 = vsel %vm949_vm9, %v1731_v7, %v1723_v60 }
 0x77c   : > { %v3366_v37 = vmul.f32 %v2871_v3, %v1737_v38  ;;  %v3369_v46 = vmul.f32 %v2876_v6, %v1741_v9 }
 0x77e   : > { %v3373_v58 = vpop.permute.xlu1 %1614  ;;  %v1577_v7 = vpop.permute.xlu0 %1576 }
 0x77f   : > { %v1582_v8 = vsel %vm827_vm5, %v1569_v47, %v1577_v7  ;;  %v1586_v3 = vsel %vm827_vm5, %v1577_v7, %v1569_v47 }
 0x780   : > { %v1592_v40 = vmul.f32 %v1586_v3, %v2784_v52  ;;  %v1593_v60 = vmul.f32 %v1582_v8, %v2787_v53  ;;  %v3721_v8 = vpack.c.bf16 %v3195_v16, %v3189_v43 }
 0x782   : > { %v1571_v31 = vpop.permute.xlu1 %1570  ;;  %v1533_v11 = vpop.permute.xlu0 %1532 }
 0x786   : > { %v1579_v38 = vpop.permute.xlu1 %1578  ;;  %v1541_v59 = vpop.permute.xlu0 %1540 }
 0x787   : > { %v1583_v6 = vsel %vm827_vm5, %v1571_v31, %v1579_v38  ;;  %v1587_v9 = vsel %vm827_vm5, %v1579_v38, %v1571_v31  ;;  %v1546_v7 = vsel %vm800_vm6, %v1533_v11, %v1541_v59  ;;  %v1550_v31 = vsel %vm800_vm6, %v1541_v59, %v1533_v11 }
 0x788   : > { %v1594_v2 = vmul.f32 %v1587_v9, %v2784_v52  ;;  %v1595_v13 = vmul.f32 %v1583_v6, %v2787_v53 }
 0x78a   : > { %v1598_v32 = vpack.c.bf16 %v1594_v2, %v1592_v40  ;;  %v1535_v21 = vpop.permute.xlu1 %1534  ;;  %v1599_v33 = vpack.c.bf16 %v1595_v13, %v1593_v60  ;;  %v1497_v47 = vpop.permute.xlu0 %1496  ;;  %v1556_v13 = vmul.f32 %v1550_v31, %v2810_v1  ;;  %v1557_v2 = vmul.f32 %v1546_v7, %v2813_v5 }
 0x78c   : > { %1820 = vmatprep.subr.bf16.mxu0 %v1599_v33 }
 0x78d   : > { %1821 = vmatpush1.bf16.msra.mxu0 %v1598_v32  ;;  %v3722_v32 = vpack.c.bf16 %v3192_v45, %v3182_v36 }
 0x78e   : > { %v1543_v38 = vpop.permute.xlu1 %1542  ;;  %1822 = vmatprep.subr.bf16.mxu0 %v3721_v8  ;;  %v1505_v40 = vpop.permute.xlu0 %1504 }
 0x78f   : > { %v1547_v52 = vsel %vm800_vm6, %v1535_v21, %v1543_v38  ;;  %v1551_v53 = vsel %vm800_vm6, %v1543_v38, %v1535_v21  ;;  %v1510_v21 = vsel %vm773_vm7, %v1497_v47, %v1505_v40  ;;  %v1514_v3 = vsel %vm773_vm7, %v1505_v40, %v1497_v47 }
 0x790   : > { %v1558_v33 = vmul.f32 %v1551_v53, %v2810_v1  ;;  %v1559_v11 = vmul.f32 %v1547_v52, %v2813_v5  ;;  %v3723_v1 = vpack.c.bf16 %v3235_v30, %v3229_v62  ;;  %v1520_v9 = vmul.f32 %v1514_v3, %v2830_v23 }
 0x791   : > { %1823 = vmatpush1.bf16.msra.mxu0 %v3722_v32  ;;  %v1521_v7 = vmul.f32 %v1510_v21, %v2833_v28  ;;  %v3724_v38 = vpack.c.bf16 %v3232_v63, %v3222_v34 }
 0x792   : > { %v1562_v43 = vpack.c.bf16 %v1558_v33, %v1556_v13  ;;  %v1499_v16 = vpop.permute.xlu1 %1498  ;;  %v1563_v59 = vpack.c.bf16 %v1559_v11, %v1557_v2  ;;  %v1461_v60 = vpop.permute.xlu0 %1460 }
 0x794   : > { %1824 = vmatprep.subr.bf16.mxu0 %v1563_v59 }
 0x795   : > { %1825 = vmatpush1.bf16.msra.mxu0 %v1562_v43  ;;  %v3726_v43 = vpack.c.bf16 %v3265_v57, %v3255_v39 }
 0x796   : > { %v1507_v6 = vpop.permute.xlu1 %1506  ;;  %1826 = vmatprep.subr.bf16.mxu0 %v3723_v1  ;;  %v1469_v45 = vpop.permute.xlu0 %1468 }
 0x797   : > { %v1511_v5 = vsel %vm773_vm7, %v1499_v16, %v1507_v6  ;;  %v1515_v36 = vsel %vm773_vm7, %v1507_v6, %v1499_v16  ;;  %v1474_v53 = vsel %vm746_vm8, %v1461_v60, %v1469_v45  ;;  %v1478_v40 = vsel %vm746_vm8, %v1469_v45, %v1461_v60 }
 0x798   : > { %v1522_v31 = vmul.f32 %v1515_v36, %v2830_v23  ;;  %v1523_v47 = vmul.f32 %v1511_v5, %v2833_v28  ;;  %v3725_v23 = vpack.c.bf16 %v3268_v54, %v3262_v48  ;;  %v1484_v2 = vmul.f32 %v1478_v40, %v2850_v55 }
 0x799   : > { %1827 = vmatpush1.bf16.msra.mxu0 %v3724_v38  ;;  %v1485_v33 = vmul.f32 %v1474_v53, %v2853_v56  ;;  %v3728_v45 = vpack.c.bf16 %v3292_v22, %v3282_v10  ;;  %v3730_v53 = vpack.c.bf16 %v3316_v20, %v3306_v15 }
 0x79a   : > { %v1526_v62 = vpack.c.bf16 %v1522_v31, %v1520_v9  ;;  %v1463_v30 = vpop.permute.xlu1 %1462  ;;  %v1527_v8 = vpack.c.bf16 %v1523_v47, %v1521_v7  ;;  %v1689_v52 = vpop.permute.xlu0 %1688 }
 0x79c   : > { %1828 = vmatprep.subr.bf16.mxu0 %v1527_v8 }
 0x79d   : > { %1829 = vmatpush1.bf16.msra.mxu0 %v1526_v62 }
 0x79e   : > { %v1471_v13 = vpop.permute.xlu1 %1470  ;;  %1830 = vmatprep.subr.bf16.mxu0 %v3725_v23  ;;  %v1697_v63 = vpop.permute.xlu0 %1696 }
 0x79f   : > { %v1475_v28 = vsel %vm746_vm8, %v1463_v30, %v1471_v13  ;;  %v1479_v34 = vsel %vm746_vm8, %v1471_v13, %v1463_v30  ;;  %v1702_v60 = vsel %vm922_vm2, %v1689_v52, %v1697_v63  ;;  %v1706_v21 = vsel %vm922_vm2, %v1697_v63, %v1689_v52  ;;  %v2352_v63 = vld [vmem:[%s3647_s2 + $0x10] ss:$0 sm:$0xff] }
 0x7a0   : > { %v1486_v11 = vmul.f32 %v1479_v34, %v2850_v55  ;;  %v1487_v32 = vmul.f32 %v1475_v28, %v2853_v56  ;;  %v3727_v55 = vpack.c.bf16 %v3295_v35, %v3289_v19  ;;  %v1712_v6 = vmul.f32 %v1702_v60, %v2724_v49 }
 0x7a1   : > { %1831 = vmatpush1.bf16.msra.mxu0 %v3726_v43  ;;  %v1713_v1 = vmul.f32 %v1706_v21, %v2727_v50 }
 0x7a2   : > { %v1490_v48 = vpack.c.bf16 %v1486_v11, %v1484_v2  ;;  %v1691_v54 = vpop.permute.xlu1 %1690  ;;  %v1491_v16 = vpack.c.bf16 %v1487_v32, %v1485_v33  ;;  %v1653_v59 = vpop.permute.xlu0 %1652  ;;  %v2353_v33 = vld [vmem:[%s3647_s2 + $0x18] ss:$0 sm:$0xff]  ;;  %v3732_v32 = vpack.c.bf16 %v3340_v42, %v3330_v17  ;;  %v2355_v42 = vld [vmem:[%s2570_s25 + $0x8] sm:$0xff] }
 0x7a4   : > { %1832 = vmatprep.subr.bf16.mxu0 %v1491_v16 }
 0x7a5   : > { %1833 = vmatpush1.bf16.msra.mxu0 %v1490_v48 }
 0x7a6   : > { %v1699_v3 = vpop.permute.xlu1 %1698  ;;  %1834 = vmatprep.subr.bf16.mxu0 %v3727_v55  ;;  %v1661_v57 = vpop.permute.xlu0 %1660  ;;  %v2354_v55 = vld [vmem:[%s2570_s25 + $0x18] sm:$0xff] }
 0x7a7   : > { %v1703_v56 = vsel %vm922_vm2, %v1691_v54, %v1699_v3  ;;  %v1707_v39 = vsel %vm922_vm2, %v1699_v3, %v1691_v54  ;;  %v1666_v31 = vsel %vm895_vm3, %v1653_v59, %v1661_v57  ;;  %v1670_v47 = vsel %vm895_vm3, %v1661_v57, %v1653_v59 }
 0x7a8   : > { %v1714_v5 = vmul.f32 %v1703_v56, %v2724_v49  ;;  %v1715_v36 = vmul.f32 %v1707_v39, %v2727_v50  ;;  %v3729_v49 = vpack.c.bf16 %v3319_v41, %v3313_v29  ;;  %v1676_v62 = vmul.f32 %v1666_v31, %v2744_v0  ;;  %v2357_v31 = vld [vmem:[%s2570_s25] sm:$0xff] }
 0x7a9   : > { %1835 = vmatpush1.bf16.msra.mxu0 %v3728_v45  ;;  %v1677_v30 = vmul.f32 %v1670_v47, %v2747_v4  ;;  %v3733_v3 = vpack.c.bf16 %v3369_v46, %v3363_v61  ;;  %v1931_v17 = vpack.c.bf16 %v2354_v55, %v2355_v42  ;;  %v3734_v45 = vpack.c.bf16 %v3366_v37, %v3360_v51 }
 0x7aa   : > { %v1718_v19 = vpack.c.bf16 %v1714_v5, %v1712_v6  ;;  %v1655_v35 = vpop.permute.xlu1 %1654  ;;  %v1719_v9 = vpack.c.bf16 %v1715_v36, %v1713_v1  ;;  %v1725_v7 = vpop.permute.xlu0 %1724  ;;  %v2282_v5 = vld [vmem:[%s3656_s11 + $0x8] ss:$12 sps:$4 sm:$0xff]   ;;  %v1607_v51 = vmul.f32 %v3116_v12, %v2648_v24  ;;  %v3738_v12 = vld [vmem:[#allocation16_spill] sm:$0xff] }
 0x7ac   : > { %1836 = vmatprep.subr.bf16.mxu0 %v1719_v9 }
 0x7ad   : > { %1837 = vmatpush2.bf16.msra.mxu0 %v1718_v19 }
 0x7ae   : > { %v1663_v38 = vpop.permute.xlu1 %1662  ;;  %1838 = vmatprep.subr.bf16.mxu0 %v3729_v49  ;;  %v1733_v22 = vpop.permute.xlu0 %1732 }
 0x7af   : > { %v1667_v50 = vsel %vm895_vm3, %v1655_v35, %v1663_v38  ;;  %v1671_v10 = vsel %vm895_vm3, %v1663_v38, %v1655_v35  ;;  %v1738_v23 = vsel %vm949_vm9, %v1725_v7, %v1733_v22  ;;  %v1742_v28 = vsel %vm949_vm9, %v1733_v22, %v1725_v7  ;;  %v2356_v7 = vld [vmem:[%s2570_s25 + $0x10] sm:$0xff]  ;;  %s2133_s25 = sshll.u32 %s500_s23, 6 }
 0x7b0   : > { %v1678_v8 = vmul.f32 %v1667_v50, %v2744_v0  ;;  %v1679_v52 = vmul.f32 %v1671_v10, %v2747_v4  ;;  %v3731_v0 = vpack.c.bf16 %v3343_v27, %v3337_v14  ;;  %v1748_v2 = vmul.f32 %v2352_v63, %v1738_v23  ;;  %s3583_s5 = scalar_lea.vmem [#allocation2], %s2133_s25 }
 0x7b1   : > { %1839 = vmatpush2.bf16.msra.mxu0 %v3730_v53  ;;  %v1749_v27 = vmul.f32 %v2353_v33, %v1742_v28  ;;  %v1930_v47 = vpack.c.bf16 %v2356_v7, %v2357_v31  ;;  %v3735_v22 = vmov 0   ;;  %s2055_s17 = sshll.u32 %s3583_s5, 4  ;;  %s3599_s17 = int_to_ptr.vmem [resolvable:$true] %s2055_s17 }
 0x7b2   : > { %v1682_v29 = vpack.c.bf16 %v1678_v8, %v1676_v62  ;;  %v1727_v41 = vpop.permute.xlu1 %1726  ;;  %v1683_v40 = vpack.c.bf16 %v1679_v52, %v1677_v30  ;;  %v1617_v13 = vpop.permute.xlu0 %1616  ;;  %v3737_v8 = vld [vmem:[#allocation9_spill] sm:$0xff]  ;;  %s2358_s4 = scalar_lea.vmem %s3599_s17, 1024  ;;  %p2365_p0 = scmp.lt.s32.totalorder %s3599_s17, %s2363_s29 }
 0x7b3   : > { %v1606_v52 = vmul.f32 %v3738_v12, %v3737_v8  ;;  %p2359_p11 = scmp.ne.s32.totalorder %s3599_s17, %s2358_s4  ;;  %p2366_p1 = scmp.lt.s32.totalorder %s2364_s30, %s2358_s4 }
 0x7b4   : > { %1840 = vmatprep.subr.bf16.mxu0 %v1683_v40 }
 0x7b5   : > { %1841 = vmatpush2.bf16.msra.mxu0 %v1682_v29  ;;  %p2360_p12 = pnand %p2359_p11, %p2550_p5  ;;  %p2367_p2 = por %p2366_p1, %p2365_p0 }
 0x7b6   : > { %v1735_v34 = vpop.permute.xlu1 %1734  ;;  %1842 = vmatprep.subr.bf16.mxu0 %v3731_v0  ;;  %v1625_v15 = vpop.permute.xlu0 %1624  ;;  %v2284_v0 = vld [vmem:[%s3656_s11] ss:$12 sps:$4 sm:$0xff]  }
 0x7b7   : > { %v1739_v20 = vsel %vm949_vm9, %v1727_v41, %v1735_v34  ;;  %v1743_v4 = vsel %vm949_vm9, %v1735_v34, %v1727_v41  ;;  %v1630_v16 = vsel %vm868_vm4, %v1617_v13, %v1625_v15  ;;  %v1634_v59 = vsel %vm868_vm4, %v1625_v15, %v1617_v13  ;;  %v3740_v41 = vld [vmem:[#allocation14_spill] sm:$0xff]  ;;  %v3743_v15 = vld [vmem:[#allocation11_spill] sm:$0xff]  ;;  %p2361_p13 = pneg %p2360_p12 }
 0x7b8   : > { %v1750_v14 = vmul.f32 %v2352_v63, %v1739_v20  ;;  %v1751_v11 = vmul.f32 %v2353_v33, %v1743_v4  ;;  %v1640_v56 = vmul.f32 %v1630_v16, %v2764_v25  ;;  %v1641_v6 = vmul.f32 %v1634_v59, %v2767_v26  ;;  %v3741_v13 = vld [vmem:[#allocation10_spill] sm:$0xff]  ;;  %v2287_v20 = vld [vmem:[%s3658_s13] sm:$0xff]   ;;  %v3742_v4 = vld [vmem:[#allocation12_spill] sm:$0xff] }
 0x7b9   : > { %1843 = vmatpush2.bf16.msra.mxu0 %v3732_v32  ;;  %v1604_v40 = vmul.f32 %v3740_v41, %v3737_v8  ;;  %v1601_v23 = vmul.f32 %v3741_v13, %v2648_v24  ;;  %v3744_v63 = vpack.c.bf16 %v3742_v4, %v3743_v15  ;;  %v2291_v33 = vld [vmem:[%s3658_s13 + $0x8] sm:$0xff]   ;;  %p2368_p3 = pnand %p2367_p2, %p2361_p13 }
 0x7ba   : > { %v1754_v43 = vpack.c.bf16 %v1750_v14, %v1748_v2  ;;  %v1619_v48 = vpop.permute.xlu1 %1618  ;;  %v1755_v54 = vpack.c.bf16 %v1751_v11, %v1749_v27  ;;  %v1621_v60 = vpop.permute.xlu0 %1620  ;;  %v2290_v2 = vld [vmem:[%s3656_s11 + $0x18] ss:$12 sps:$4 sm:$0xff]  }
 0x7bb   : > { %v1628_v46 = vsel %vm868_vm4, %v3351_v18, %v1621_v60  ;;  %v1632_v36 = vsel %vm868_vm4, %v1621_v60, %v3351_v18  ;;  %v1610_v28 = vpack.c.bf16 %v1606_v52, %v1604_v40 }
 0x7bc   : > { %1885 = vmatprep.subr.bf16.mxu1 %v1755_v54  ;;  %v1636_v38 = vmul.f32 %v1628_v46, %v2764_v25  ;;  %v1637_v37 = vmul.f32 %v1632_v36, %v2767_v26 }
 0x7bd   : > { %1886 = vmatpush1.bf16.msra.mxu1 %v1754_v43 }
 0x7be   : > { %v1627_v21 = vpop.permute.xlu1 %1626  ;;  %1887 = vmatprep.subr.bf16.mxu1 %v3733_v3 }
 0x7bf   : > { %v1631_v39 = vsel %vm868_vm4, %v1619_v48, %v1627_v21  ;;  %v1635_v57 = vsel %vm868_vm4, %v1627_v21, %v1619_v48 }
 0x7c0   : > { %v1642_v61 = vmul.f32 %v1631_v39, %v2764_v25  ;;  %v1643_v1 = vmul.f32 %v1635_v57, %v2767_v26 }
 0x7c1   : > { %1888 = vmatpush1.bf16.msra.mxu1 %v3734_v45 }
 0x7c2   : > { %v1646_v19 = vpack.c.bf16 %v1642_v61, %v1640_v56  ;;  %v1623_v35 = vpop.permute.xlu1 %1622  ;;  %v1647_v9 = vpack.c.bf16 %v1643_v1, %v1641_v6  ;;  %1986 = vmatprep.subr.bf16.mxu1 %v1931_v17 }
 0x7c3   : > { %v1629_v49 = vsel %vm868_vm4, %v3373_v58, %v1623_v35  ;;  %v1633_v18 = vsel %vm868_vm4, %v1623_v35, %v3373_v58  ;;  %v1605_v58 = vmul.f32 %v3736_v44, %v2648_v24 }
 0x7c4   : > { %v1638_v50 = vmul.f32 %v1629_v49, %v2764_v25  ;;  %v1639_v10 = vmul.f32 %v1633_v18, %v2767_v26  ;;  %1844 = vmatprep.subr.bf16.mxu0 %v1647_v9  ;;  %2170 = vmatmul.mubr.msk.bf16.vlgmr.msra.gmra.mxu1 %vm1149_vm10, %v2282_v5  ;;  %v2283_v25 = vld [vmem:[%s3656_s11 + $0x20] ss:$12 sps:$4 sm:$0xff]  }
 0x7c5   : > { %1845 = vmatpush2.bf16.msra.mxu0 %v1646_v19  ;;  %1915 = vmatprep.mubr.bf16.mxu1 %v3735_v22  ;;  %v1611_v53 = vpack.c.bf16 %v1607_v51, %v1605_v58  ;;  %v3739_v26 = vld [vmem:[#allocation13_spill] sm:$0xff] }
 0x7c6   : > { %v1644_v62 = vpack.c.bf16 %v1638_v50, %v1636_v38  ;;  %v1645_v30 = vpack.c.bf16 %v1639_v10, %v1637_v37  ;;  %1987 = vmatpush1.bf16.msra.mxu1 %v1930_v47  ;;  %v1603_v29 = vmul.f32 %v3739_v26, %v2648_v24  ;;  %v2288_v24 = vld [vmem:[%s3656_s11 + $0x1c] ss:$12 sps:$4 sm:$0xff]  }
 0x7c7   : > { %v1767_v32 = vpop.permute.xlu0 %1766 }
 0x7c8   : > { %1846 = vmatprep.subr.bf16.mxu0 %v1645_v30  ;;  %v1609_v34 = vpack.c.bf16 %v1603_v29, %v1601_v23 }
 0x7c9   : > { %1847 = vmatpush2.bf16.msra.mxu0 %v1644_v62 }
 0x7ca   : > { %1848 = vmatprep.subr.bf16.mxu0 %v1611_v53 }
 0x7cb   : > { %v1777_v59 = vpop.permute.xlu0 %1776 }
 0x7cc   : > { %2171 = vmatmul.mubr.msk.bf16.gmra.mxu1 %vm1149_vm10, %v2283_v25 }
 0x7cd   : > { %1849 = vmatpush2.bf16.msra.mxu0 %v1610_v28  ;;  %2004 = vmatprep.mubr.bf16.mxu1 %v3735_v22 }
 0x7ce   : > { %1850 = vmatprep.subr.bf16.mxu0 %v1609_v34 }
 0x7cf   : > { %v1772_v54 = vpop.permute.xlu1 %1771  ;;  %v1939_v17 = vpop.permute.xlu0 %1938 }
 0x7d1   : > { %1851 = vmatpush2.bf16.msra.mxu0 %v3744_v63 }
 0x7d3   : > { %v1782_v3 = vpop.permute.xlu1 %1781  ;;  %v1949_v50 = vpop.permute.xlu0 %1948 }
 0x7d4   : > { %1853 = vmatmul.mubr.bf16.vlgmr.msra.gmra.mxu0 %v2284_v0  ;;  %2174 = vmatmul.mubr.msk.bf16.vlgmr.msra.gmra.mxu1 %vm547_vm0, %v2287_v20 }
 0x7d5   : > { %1862 = vmatprep.mubr.bf16.mxu0 %v2288_v24  ;;  %2014 = vmatprep.mubr.bf16.mxu1 %v3735_v22 }
 0x7d7   : > { %v1944_v36 = vpop.permute.xlu1 %1943 }
 0x7db   : > { %v1954_v29 = vpop.permute.xlu1 %1953 }
 0x7dc   : > { %1863 = vmatmul.mubr.bf16.gmra.mxu0 %v2290_v2  ;;  %2175 = vmatmul.mubr.msk.bf16.gmra.mxu1 %vm547_vm0, %v2291_v33 }
 0x884   : > { %v1907_v27 = vpop.f32.mrf.mxu1 }
 0x886   : > { %v1909_v14 = vpop.f32.mrf.mxu1 }
 0x888   : > { %v1911_v11 = vpop.f32.mrf.mxu1 }
 0x88a   : > { %v1913_v43 = vpop.f32.mrf.mxu1 }
 0x88c   : > { %v1917_v48 = vpop.f32.mrf.mxu1 }
 0x88e   : > { %v1919_v16 = vpop.f32.mrf.mxu1 }
 0x890   : > { %v1921_v60 = vpop.f32.mrf.mxu1 }
 0x892   : > { %v1923_v21 = vpop.f32.mrf.mxu1 }
 0x894   : > { %v1854_v55 = vpop.f32.mrf.mxu0  ;;  %v2006_v42 = vpop.f32.mrf.mxu1 }
 0x895   : > { %v1855_v56 = vadd.f32 %v1854_v55, %v1767_v32  ;;  %v2007_v46 = vadd.f32 %v2006_v42, %v1939_v17 }
 0x896   : > { %v1856_v39 = vpop.f32.mrf.mxu0  ;;  %v2008_v57 = vpop.f32.mrf.mxu1 }
 0x897   : > { %v1908_v6 = vadd.f32 %v1907_v27, %v1855_v56  ;;  %v1857_v61 = vadd.f32 %v1856_v39, %v1767_v32  ;;  %v2009_v35 = vadd.f32 %v2008_v57, %v1939_v17 }
 0x898   : > { %v1858_v1 = vpop.f32.mrf.mxu0  ;;  %v2010_v5 = vpop.f32.mrf.mxu1 }
 0x899   : > { %v2025_v45 = vadd.f32 %v2007_v46, %v1908_v6  ;;  %v1910_v19 = vadd.f32 %v1909_v14, %v1857_v61  ;;  %v1859_v9 = vadd.f32 %v1858_v1, %v1772_v54  ;;  %v2011_v49 = vadd.f32 %v2010_v5, %v1944_v36 }
 0x89a   : > { %v1860_v7 = vpop.f32.mrf.mxu0  ;;  %v2012_v31 = vpop.f32.mrf.mxu1 }
 0x89b   : > { %2033 = vst [vmem:[%s3583_s5] sm:$0xff] %v2025_v45  ;;  %v2026_v47 = vadd.f32 %v2009_v35, %v1910_v19  ;;  %v1912_v38 = vadd.f32 %v1911_v11, %v1859_v9  ;;  %v1861_v18 = vadd.f32 %v1860_v7, %v1772_v54  ;;  %v2013_v62 = vadd.f32 %v2012_v31, %v1944_v36 }
 0x89c   : > { %v1864_v51 = vpop.f32.mrf.mxu0  ;;  %v2016_v37 = vpop.f32.mrf.mxu1 }
 0x89d   : > { %2034 = vst [vmem:[%s3583_s5 + $0x8] sm:$0xff] %v2026_v47  ;;  %v2027_v10 = vadd.f32 %v2011_v49, %v1912_v38  ;;  %v1914_v22 = vadd.f32 %v1913_v43, %v1861_v18  ;;  %v1865_v30 = vadd.f32 %v1864_v51, %v1777_v59  ;;  %v2017_v52 = vadd.f32 %v2016_v37, %v1949_v50 }
 0x89e   : > { %v1866_v44 = vpop.f32.mrf.mxu0  ;;  %v2018_v58 = vpop.f32.mrf.mxu1 }
 0x89f   : > { %2035 = vst [vmem:[%s3583_s5 + $0x10] sm:$0xff] %v2027_v10  ;;  %v2028_v8 = vadd.f32 %v2013_v62, %v1914_v22  ;;  %v1918_v12 = vadd.f32 %v1917_v48, %v1865_v30  ;;  %v1867_v53 = vadd.f32 %v1866_v44, %v1777_v59  ;;  %v2019_v13 = vadd.f32 %v2018_v58, %v1949_v50 }
 0x8a0   : > { %v1868_v25 = vpop.f32.mrf.mxu0  ;;  %v2020_v26 = vpop.f32.mrf.mxu1 }
 0x8a1   : > { %2036 = vst [vmem:[%s3583_s5 + $0x18] sm:$0xff] %v2028_v8  ;;  %v2029_v41 = vadd.f32 %v2017_v52, %v1918_v12  ;;  %v1920_v40 = vadd.f32 %v1919_v16, %v1867_v53  ;;  %v1869_v23 = vadd.f32 %v1868_v25, %v1782_v3  ;;  %v2021_v4 = vadd.f32 %v2020_v26, %v1954_v29 }
 0x8a2   : > { %v1870_v28 = vpop.f32.mrf.mxu0  ;;  %v2022_v34 = vpop.f32.mrf.mxu1 }
 0x8a3   : > { %2037 = vst [vmem:[%s3583_s5 + $0x20] sm:$0xff] %v2029_v41  ;;  %v2030_v0 = vadd.f32 %v2019_v13, %v1920_v40  ;;  %v1922_v20 = vadd.f32 %v1921_v60, %v1869_v23  ;;  %v1871_v15 = vadd.f32 %v1870_v28, %v1782_v3  ;;  %v2023_v2 = vadd.f32 %v2022_v34, %v1954_v29 }
 0x8a5   : > { %2038 = vst [vmem:[%s3583_s5 + $0x28] sm:$0xff] %v2030_v0  ;;  %v2031_v63 = vadd.f32 %v2021_v4, %v1922_v20  ;;  %v1924_v24 = vadd.f32 %v1923_v21, %v1871_v15 }
 0x8a7   : > { %2039 = vst [vmem:[%s3583_s5 + $0x30] sm:$0xff] %v2031_v63  ;;  %v2032_v33 = vadd.f32 %v2023_v2, %v1924_v24 }
 0x8a9   : > { %2040 = vst [vmem:[%s3583_s5 + $0x38] sm:$0xff] %v2032_v33 }
 0x8aa   : > { %2371 = shalt.err (!%p2368_p3)
}
 0x8ab   : > { %s2372_s0 = scalar_lea.hbm %s3596_s27, 1024  ;;  %s2376_s5 = scalar_lea.hbm %s3660_s15, 2048 }
 0x8ac   : > { %p2373_p4 = scmp.ne.s32.totalorder %s3596_s27, %s2372_s0  ;;  %p2377_p9 = scmp.lt.s32.totalorder %s3596_s27, %s3660_s15 }
 0x8ad   : > { %p2378_p10 = scmp.lt.s32.totalorder %s2376_s5, %s2372_s0 }
 0x8ae   : > { %p2374_p7 = pnand %p2373_p4, %p2550_p5 }
 0x8af   : > { %p2379_p11 = por %p2378_p10, %p2377_p9 }
 0x8b0   : > { %p2375_p8 = pneg %p2374_p7 }
 0x8b2   : > { %p2380_p12 = pnand %p2379_p11, %p2375_p8 }
 0x8b4   : > { %2383 = shalt.err (!%p2380_p12)
}
 0x8b5   : > { %s2431_s3 = smov 256  }
 0x8b6   : > { %2217 = dma.vmem_to_hbm [thread:$0]  (%p2550_p5), %s3599_s17, 1024, %s3596_s27, %s3604_s22, %s2431_s3, %s2431_s3, %s3713_s24  }
 0x8b7 PF: > { %p2223_p13 = scmp.ge.s32.totalorder %s2418_s21, 2  ;;  %s2070_s20 = sand.u32 1, %s2406_s18  }
 0x8b8   : > { %s2071_s29 = scalar_lea.sflag [#allocation3], %s2070_s20 }
 0x8b9   : > { %p2220_p0 = pnand %p2223_p13, %p2554_p6 }
 0x8bb   : > { %p2221_p1 = pneg %p2220_p0 }
 0x8bd   : > { %2401 = dma.done.wait (%p2221_p1), %s2071_s29, 1024  }
 0x8be   : > { %2403 = vsyncadd (%p2221_p1), %s2071_s29, 4294966272  ;;  %s3746_s21 = sld [smem:[#allocation6_spill]]  ;;  %s3749_s18 = smov %s2410_s19 }
 0x8bf   : > { %s3747_s28 = sld [smem:[#allocation5_spill]] }
 0x8c0   : > { %s3748_s20 = sld [smem:[#allocation7_spill]] }
 0x8c4   : > { %p25_p2 = scmp.ge.s32.totalorder %s3746_s21, 4  }
 0x8c5   : > { %s3750_s19 = smov %s3747_s28 }
 0x8c6   :  { %27 = sbr.rel (!%p25_p2) target bundleno = 8 (0x8), region = 118 }
 0x8cb   :  { %2076 = vsyncpa [#allocation3], 1 }
 0x8cc   :  { %2078 = vsyncpa [#allocation3 + $0x1], 1 }

</bundles_post_ra>
